<compile_context>
chip_gen: v7x
topology: tpu7x:2x2x1
jax: 0.10.0
libtpu: 0.0.40
codegen_flags: <defaults>
</compile_context>

<pallas_src>
import functools

import jax
import jax.numpy as jnp
from jax import lax
from jax.experimental import pallas as pl
from jax.experimental.pallas import tpu as pltpu


# ----------------------------- in-kernel helpers -----------------------------

def _layernorm(x, g, b, eps=1e-5):
    mu = jnp.mean(x, axis=-1, keepdims=True)
    xc = x - mu
    var = jnp.mean(xc * xc, axis=-1, keepdims=True)
    return xc * lax.rsqrt(var + eps) * g + b


def _softmax(x):
    m = jnp.max(x, axis=-1, keepdims=True)
    e = jnp.exp(x - m)
    denom = jnp.sum(e, axis=-1, keepdims=True)
    return e * pl.reciprocal(denom, approx=True)


def _mm(a, b):
    return jnp.dot(a, b, preferred_element_type=jnp.float32)


# --------------------------------- the kernel --------------------------------

def esf_kernel(
    T, Bp,                       # static (bound via functools.partial)
    # time-major, batch-flattened sequences: row t*Bp + b  ==  (t, b)
    base_ref,                    # [T*Bp, D]  activity embeddings (stage-1 input)
    feat_ref,                    # [T*Bp, F]  full input feature  (stage-2 input)
    # stage1: EnableStateModel
    w1i0_ref, w1h0_ref, b10_ref,     # [D,H1] [H1,H1] [1,H1]
    w1l1_ref, b11_ref,               # [2*H1,H1] [1,H1]   packed [W_ih1; W_hh1]
    s1_lng_ref, s1_lnb_ref,          # [1,H1] [1,H1]
    s1_fcw_ref, s1_fcb_ref,          # [H1,A] [1,A]
    # stage2: PredictionModel (cross_feature folded into the layer-0 input proj)
    w2in_ref, b2in_ref,              # [F,H2] [1,H2]
    w2h0_ref,                        # [H2,H2]
    w2l1_ref, b21_ref,               # [2*H2,H2] [1,H2]   packed [W_ih1; W_hh1]
    s2_lng_ref, s2_lnb_ref,          # [1,H2] [1,H2]
    fc1_wa_ref, fc1_wb_ref, fc1_b_ref,   # [H2,H2] [A,H2] [1,H2]
    fc2_w_ref, fc2_b_ref,            # [H2,A] [1,A]
    # outputs
    es_ref,                          # [Bp, A] softmax(enable_state)
    out_ref,                         # [Bp, A] prediction * softmax(enable_state)
    # scratch
    xp1_ref,                         # [T*Bp, H1] f32 — batched stage-1 input proj
    xp2_ref,                         # [T*Bp, H2] f32 — batched stage-2 input proj
):
    H1 = w1h0_ref.shape[0]
    H2 = w2h0_ref.shape[0]

    # ---- batched input projections (hoisted off the recurrent critical path) ----
    xp1_ref[...] = _mm(base_ref[...], w1i0_ref[...]) + b10_ref[...]
    xp2_ref[...] = _mm(feat_ref[...], w2in_ref[...]) + b2in_ref[...]

    # recurrent weights (small, loop-invariant)
    W1h0 = w1h0_ref[...]
    W1L1 = w1l1_ref[...]
    b11 = b11_ref[...]
    W2h0 = w2h0_ref[...]
    W2L1 = w2l1_ref[...]
    b21 = b21_ref[...]

    h0 = jnp.zeros((Bp, H1), jnp.float32)
    h1 = jnp.zeros((Bp, H1), jnp.float32)
    g0 = jnp.zeros((Bp, H2), jnp.float32)
    g1 = jnp.zeros((Bp, H2), jnp.float32)

    # ---- fused, fully-unrolled recurrence (T static & small) --------------------
    # stage-1 and stage-2 chains are independent; interleaving them fills the
    # MXU/FIFO bubbles of each latency-bound chain.
    for t in range(T):
        x1 = xp1_ref[t * Bp:(t + 1) * Bp, :]             # static, sublane-aligned
        x2 = xp2_ref[t * Bp:(t + 1) * Bp, :]
        h0 = jnp.tanh(x1 + _mm(h0, W1h0))
        g0 = jnp.tanh(x2 + _mm(g0, W2h0))
        h1 = jnp.tanh(_mm(jnp.concatenate([h0, h1], axis=-1), W1L1) + b11)
        g1 = jnp.tanh(_mm(jnp.concatenate([g0, g1], axis=-1), W2L1) + b21)

    # ---- stage-1 head: LayerNorm (per-position -> last hidden) + FC -------------
    ln1 = _layernorm(h1, s1_lng_ref[...], s1_lnb_ref[...])
    # dropout: identity (eval mode)
    enable_state = _mm(ln1, s1_fcw_ref[...]) + s1_fcb_ref[...]       # raw logits
    es_soft = _softmax(enable_state)

    # ---- stage-2 head ------------------------------------------------------------
    ln2 = _layernorm(g1, s2_lng_ref[...], s2_lnb_ref[...])
    # fc_1(cat([final_hidden, enable_state_logits])) split into two matmuls
    hid = _mm(ln2, fc1_wa_ref[...]) + _mm(enable_state, fc1_wb_ref[...]) + fc1_b_ref[...]
    hid = jnp.maximum(hid, 0.0)                                      # ReLU
    logits = _mm(hid, fc2_w_ref[...]) + fc2_b_ref[...]
    pred = _softmax(logits)

    es_ref[...] = es_soft
    out_ref[...] = pred * es_soft


# --------------------------------- JAX glue ----------------------------------

def _embed_with_unseen(ids, weight, num_valid):
    """Replicates the PyTorch unseen-index handling (clamp + mean of weight[1:])."""
    clamped = jnp.clip(ids, 0, num_valid)
    emb = jnp.take(weight, clamped, axis=0)                       # [B, T, D]
    unseen = jnp.mean(weight[1:], axis=0)                         # [D]
    return jnp.where((ids == num_valid + 1)[..., None], unseen, emb)


def get_input_feature(batch_data, params, activity_num, add_attr_num):
    act_ids = batch_data[:, 0, :].astype(jnp.int32)               # [B, T]
    act_emb = _embed_with_unseen(act_ids, params["activity_embedding"], activity_num)
    time_feature = jnp.transpose(batch_data[:, 1:5, :], (0, 2, 1))  # [B, T, 4]

    cat_embs = [act_emb]
    num_embs = [time_feature]
    for i, attr_num in enumerate(add_attr_num):
        feat = batch_data[:, 5 + i, :]
        if attr_num > 0:
            ids = feat.astype(jnp.int32)
            w = params["add_attr_embeddings"][i]
            cat_embs.append(_embed_with_unseen(ids, w, attr_num))
        else:
            num_embs.append(feat[..., None])

    cat = jnp.concatenate(cat_embs, axis=-1)
    num = jnp.concatenate(num_embs, axis=-1)
    input_feature = jnp.concatenate([cat, num], axis=-1)
    # NOTE: the PyTorch module returns (activity_embeddings, input_feature);
    # base_feature in forward() is therefore just the activity embeddings.
    return act_emb, input_feature


def init_params(key, activity_num, dimension, h1, h2, add_attr_num):
    """Deterministic synthetic parameter initialization (matches module shapes)."""
    A, D = activity_num, dimension
    F = (1 + sum(1 for n in add_attr_num if n > 0)) * D + add_attr_num.count(0) + 4

    keys = iter(jax.random.split(key, 64))

    def rnd(shape, scale=0.1):
        return (scale * jax.random.normal(next(keys), shape)).astype(jnp.float32)

    p = {}
    # embeddings (padding_idx=0 -> row 0 zeroed)
    act_w = rnd((A + 1, D))
    p["activity_embedding"] = act_w.at[0].set(0.0)
    p["add_attr_embeddings"] = []
    for n in add_attr_num:
        if n > 0:
            w = rnd((n + 1, D))
            p["add_attr_embeddings"].append(w.at[0].set(0.0))
        else:
            p["add_attr_embeddings"].append(None)

    def vec(n):  # biases kept 2-D [1, n] for TPU-friendly layout
        return rnd((1, n))

    # stage1: RNN(D->H1, 2 layers) + LN(H1) + FC(H1->A)
    p["s1"] = dict(
        wih0=rnd((D, h1)), whh0=rnd((h1, h1)), b0=vec(h1),   # b0 = b_ih0 + b_hh0
        wih1=rnd((h1, h1)), whh1=rnd((h1, h1)), b1=vec(h1),
        ln_g=jnp.ones((1, h1), jnp.float32), ln_b=jnp.zeros((1, h1), jnp.float32),
        fc_w=rnd((h1, A)), fc_b=vec(A),
    )
    # stage2: cross_feature(2F->H2), RNN(H2->H2, 2 layers), LN, fc_1(H2+A->H2), fc_2(H2->A)
    p["s2"] = dict(
        cf_wa=rnd((F, h2)), cf_wb=rnd((F, h2)), cf_b=vec(h2),
        wih0=rnd((h2, h2)), whh0=rnd((h2, h2)), b0=vec(h2),
        wih1=rnd((h2, h2)), whh1=rnd((h2, h2)), b1=vec(h2),
        ln_g=jnp.ones((1, h2), jnp.float32), ln_b=jnp.zeros((1, h2), jnp.float32),
        fc1_wa=rnd((h2, h2)), fc1_wb=rnd((A, h2)), fc1_b=vec(h2),
        fc2_w=rnd((h2, A)), fc2_b=vec(A),
    )
    p["input_feature_size"] = F
    return p


@functools.partial(jax.jit,
                   static_argnames=("activity_num", "add_attr_num", "matmul_dtype"))
def esf_forward(batch_data, params, *, activity_num, add_attr_num,
                matmul_dtype=jnp.float32):
    base_feature, input_feature = get_input_feature(
        batch_data, params, activity_num, add_attr_num)
    B, T, D = base_feature.shape
    F = input_feature.shape[-1]
    A = activity_num

    s1, s2 = params["s1"], params["s2"]
    H1 = s1["whh0"].shape[0]
    H2 = s2["whh0"].shape[0]

    # ---- weight folding (tiny XLA ops, exact algebra) ----------------------------
    # layer-1 packed recurrent weights: [h0 | h1] @ [W_ih1; W_hh1]
    W1L1 = jnp.concatenate([s1["wih1"], s1["whh1"]], axis=0)         # [2*H1, H1]
    W2L1 = jnp.concatenate([s2["wih1"], s2["whh1"]], axis=0)         # [2*H2, H2]
    # cross_feature(cat([x,x])) == x @ (Wa + Wb) + b; fold through RNN layer-0 W_ih
    Wc = s2["cf_wa"] + s2["cf_wb"]                                   # [F, H2]
    W2in = Wc @ s2["wih0"]                                           # [F, H2]
    b2in = s2["cf_b"] @ s2["wih0"] + s2["b0"]                        # [1, H2]

    # ---- lane/sublane-friendly layout: pad batch to a multiple of 8 --------------
    Bp = max(8, ((B + 7) // 8) * 8)
    pad_b = Bp - B
    base_p = jnp.pad(base_feature, ((0, pad_b), (0, 0), (0, 0)))
    feat_p = jnp.pad(input_feature, ((0, pad_b), (0, 0), (0, 0)))
    # time-major, flattened: row index = t * Bp + b
    base_flat = jnp.transpose(base_p, (1, 0, 2)).reshape(T * Bp, D).astype(matmul_dtype)
    feat_flat = jnp.transpose(feat_p, (1, 0, 2)).reshape(T * Bp, F).astype(matmul_dtype)
    w1i0 = s1["wih0"].astype(matmul_dtype)
    w2in = W2in.astype(matmul_dtype)

    kernel_inputs = (
        base_flat, feat_flat,
        w1i0, s1["whh0"], s1["b0"], W1L1, s1["b1"],
        s1["ln_g"], s1["ln_b"], s1["fc_w"], s1["fc_b"],
        w2in, b2in, s2["whh0"], W2L1, s2["b1"],
        s2["ln_g"], s2["ln_b"],
        s2["fc1_wa"], s2["fc1_wb"], s2["fc1_b"], s2["fc2_w"], s2["fc2_b"],
    )

    vmem_spec = pl.BlockSpec(memory_space=pltpu.MemorySpace.VMEM)
    es_soft, out = pl.pallas_call(
        functools.partial(esf_kernel, T, Bp),
        out_shape=(
            jax.ShapeDtypeStruct((Bp, A), jnp.float32),
            jax.ShapeDtypeStruct((Bp, A), jnp.float32),
        ),
        in_specs=[vmem_spec] * len(kernel_inputs),
        out_specs=(vmem_spec, vmem_spec),
        scratch_shapes=[
            pltpu.VMEM((T * Bp, H1), jnp.float32),
            pltpu.VMEM((T * Bp, H2), jnp.float32),
        ],
    )(*kernel_inputs)

    # drop padded batch rows
    return es_soft[:B], out[:B]
    # TODO(synk): for production-scale B / v7x, add a batch grid axis
    # (dimension_semantics=("parallel",)) and T-chunk the projections to fit 64 MiB VMEM.


# ------------------------------------ main ------------------------------------

if __name__ == "__main__":
    # Small synthetic configuration consistent with the module.
    activity_num = 6
    dimension = 8
    hidden_size_1 = 32
    hidden_size_2 = 32
    add_attr_num = (3, 0)          # one categorical attr (3 values), one numeric attr
    B, T = 2, 8

    key = jax.random.PRNGKey(0)
    k_param, k_act, k_time, k_cat, k_num = jax.random.split(key, 5)

    params = init_params(k_param, activity_num, dimension,
                         hidden_size_1, hidden_size_2, list(add_attr_num))

    # batch_data layout: [B, 5 + len(add_attr_num), T]
    #   row 0     : activity ids in [0, activity_num+1]  (activity_num+1 == "unseen")
    #   rows 1..4 : time features (float)
    #   row 5+    : additional attributes (categorical ids or numeric floats)
    act_ids = jax.random.randint(k_act, (B, 1, T), 0, activity_num + 2).astype(jnp.float32)
    time_f = jax.random.normal(k_time, (B, 4, T), dtype=jnp.float32)
    cat_ids = jax.random.randint(k_cat, (B, 1, T), 0, add_attr_num[0] + 2).astype(jnp.float32)
    num_f = jax.random.normal(k_num, (B, 1, T), dtype=jnp.float32)
    batch_data = jnp.concatenate([act_ids, time_f, cat_ids, num_f], axis=1)  # [2, 7, 8]

    es_soft, output = esf_forward(
        batch_data, params, activity_num=activity_num, add_attr_num=add_attr_num)
    jax.block_until_ready((es_soft, output))

    assert es_soft.shape == (B, activity_num)
    assert output.shape == (B, activity_num)
    assert bool(jnp.all(jnp.isfinite(es_soft))) and bool(jnp.all(jnp.isfinite(output)))
    print("KERNEL_OK")
</pallas_src>

<mosaic_0001>
module attributes {stable_mosaic.version = 11 : i64} {
  func.func @esf_kernel(%arg0: memref<64x8xf32, #tpu.memory_space<vmem>>, %arg1: memref<64x21xf32, #tpu.memory_space<vmem>>, %arg2: memref<8x32xf32, #tpu.memory_space<vmem>>, %arg3: memref<32x32xf32, #tpu.memory_space<vmem>>, %arg4: memref<1x32xf32, #tpu.memory_space<vmem>>, %arg5: memref<64x32xf32, #tpu.memory_space<vmem>>, %arg6: memref<1x32xf32, #tpu.memory_space<vmem>>, %arg7: memref<1x32xf32, #tpu.memory_space<vmem>>, %arg8: memref<1x32xf32, #tpu.memory_space<vmem>>, %arg9: memref<32x6xf32, #tpu.memory_space<vmem>>, %arg10: memref<1x6xf32, #tpu.memory_space<vmem>>, %arg11: memref<21x32xf32, #tpu.memory_space<vmem>>, %arg12: memref<1x32xf32, #tpu.memory_space<vmem>>, %arg13: memref<32x32xf32, #tpu.memory_space<vmem>>, %arg14: memref<64x32xf32, #tpu.memory_space<vmem>>, %arg15: memref<1x32xf32, #tpu.memory_space<vmem>>, %arg16: memref<1x32xf32, #tpu.memory_space<vmem>>, %arg17: memref<1x32xf32, #tpu.memory_space<vmem>>, %arg18: memref<32x32xf32, #tpu.memory_space<vmem>>, %arg19: memref<6x32xf32, #tpu.memory_space<vmem>>, %arg20: memref<1x32xf32, #tpu.memory_space<vmem>>, %arg21: memref<32x6xf32, #tpu.memory_space<vmem>>, %arg22: memref<1x6xf32, #tpu.memory_space<vmem>>, %arg23: memref<8x6xf32, #tpu.memory_space<vmem>>, %arg24: memref<8x6xf32, #tpu.memory_space<vmem>>, %arg25: memref<64x32xf32, #tpu.memory_space<vmem>>, %arg26: memref<64x32xf32, #tpu.memory_space<vmem>>) attributes {dimension_semantics = [], scalar_prefetch = 0 : i64, scratch_operands = 2 : i64, tpu.core_type = #tpu.core_type<tc>} {
    %c0 = arith.constant 0 : index
    %c0_0 = arith.constant 0 : index
    %0 = vector.load %arg0[%c0, %c0_0] : memref<64x8xf32, #tpu.memory_space<vmem>>, vector<64x8xf32>
    %c0_1 = arith.constant 0 : index
    %c0_2 = arith.constant 0 : index
    %1 = vector.load %arg2[%c0_1, %c0_2] : memref<8x32xf32, #tpu.memory_space<vmem>>, vector<8x32xf32>
    %cst = arith.constant dense<0.000000e+00> : vector<64x32xf32>
    %2 = tpu.matmul %0, %1, %cst {dimension_numbers = #tpu.dot_dimension_numbers<[1], [0], [0], [1], [0, 0, 1, 1], [], []>} : vector<64x8xf32>, vector<8x32xf32>, vector<64x32xf32> -> vector<64x32xf32>
    %c0_3 = arith.constant 0 : index
    %c0_4 = arith.constant 0 : index
    %3 = vector.load %arg4[%c0_3, %c0_4] : memref<1x32xf32, #tpu.memory_space<vmem>>, vector<1x32xf32>
    %4 = vector.broadcast %3 : vector<1x32xf32> to vector<64x32xf32>
    %5 = arith.addf %2, %4 : vector<64x32xf32>
    %c0_5 = arith.constant 0 : index
    %c0_6 = arith.constant 0 : index
    %6 = vector.load %arg25[%c0_5, %c0_6] : memref<64x32xf32, #tpu.memory_space<vmem>>, vector<64x32xf32>
    tpu.vector_store %arg25[%c0_5, %c0_6], %5 {strides = array<i32>} : memref<64x32xf32, #tpu.memory_space<vmem>>, vector<64x32xf32>,
    %c0_7 = arith.constant 0 : index
    %c0_8 = arith.constant 0 : index
    %7 = vector.load %arg1[%c0_7, %c0_8] : memref<64x21xf32, #tpu.memory_space<vmem>>, vector<64x21xf32>
    %c0_9 = arith.constant 0 : index
    %c0_10 = arith.constant 0 : index
    %8 = vector.load %arg11[%c0_9, %c0_10] : memref<21x32xf32, #tpu.memory_space<vmem>>, vector<21x32xf32>
    %cst_11 = arith.constant dense<0.000000e+00> : vector<64x32xf32>
    %9 = tpu.matmul %7, %8, %cst_11 {dimension_numbers = #tpu.dot_dimension_numbers<[1], [0], [0], [1], [0, 0, 1, 1], [], []>} : vector<64x21xf32>, vector<21x32xf32>, vector<64x32xf32> -> vector<64x32xf32>
    %c0_12 = arith.constant 0 : index
    %c0_13 = arith.constant 0 : index
    %10 = vector.load %arg12[%c0_12, %c0_13] : memref<1x32xf32, #tpu.memory_space<vmem>>, vector<1x32xf32>
    %11 = vector.broadcast %10 : vector<1x32xf32> to vector<64x32xf32>
    %12 = arith.addf %9, %11 : vector<64x32xf32>
    %c0_14 = arith.constant 0 : index
    %c0_15 = arith.constant 0 : index
    %13 = vector.load %arg26[%c0_14, %c0_15] : memref<64x32xf32, #tpu.memory_space<vmem>>, vector<64x32xf32>
    tpu.vector_store %arg26[%c0_14, %c0_15], %12 {strides = array<i32>} : memref<64x32xf32, #tpu.memory_space<vmem>>, vector<64x32xf32>,
    %c0_16 = arith.constant 0 : index
    %c0_17 = arith.constant 0 : index
    %14 = vector.load %arg3[%c0_16, %c0_17] : memref<32x32xf32, #tpu.memory_space<vmem>>, vector<32x32xf32>
    %c0_18 = arith.constant 0 : index
    %c0_19 = arith.constant 0 : index
    %15 = vector.load %arg5[%c0_18, %c0_19] : memref<64x32xf32, #tpu.memory_space<vmem>>, vector<64x32xf32>
    %c0_20 = arith.constant 0 : index
    %c0_21 = arith.constant 0 : index
    %16 = vector.load %arg6[%c0_20, %c0_21] : memref<1x32xf32, #tpu.memory_space<vmem>>, vector<1x32xf32>
    %c0_22 = arith.constant 0 : index
    %c0_23 = arith.constant 0 : index
    %17 = vector.load %arg13[%c0_22, %c0_23] : memref<32x32xf32, #tpu.memory_space<vmem>>, vector<32x32xf32>
    %c0_24 = arith.constant 0 : index
    %c0_25 = arith.constant 0 : index
    %18 = vector.load %arg14[%c0_24, %c0_25] : memref<64x32xf32, #tpu.memory_space<vmem>>, vector<64x32xf32>
    %c0_26 = arith.constant 0 : index
    %c0_27 = arith.constant 0 : index
    %19 = vector.load %arg15[%c0_26, %c0_27] : memref<1x32xf32, #tpu.memory_space<vmem>>, vector<1x32xf32>
    %cst_28 = arith.constant 0.000000e+00 : f32
    %20 = vector.broadcast %cst_28 : f32 to vector<8x32xf32>
    %cst_29 = arith.constant 0.000000e+00 : f32
    %21 = vector.broadcast %cst_29 : f32 to vector<8x32xf32>
    %cst_30 = arith.constant 0.000000e+00 : f32
    %22 = vector.broadcast %cst_30 : f32 to vector<8x32xf32>
    %cst_31 = arith.constant 0.000000e+00 : f32
    %23 = vector.broadcast %cst_31 : f32 to vector<8x32xf32>
    %c0_32 = arith.constant 0 : index
    %c0_33 = arith.constant 0 : index
    %24 = vector.load %arg25[%c0_32, %c0_33] : memref<64x32xf32, #tpu.memory_space<vmem>>, vector<8x32xf32>
    %c0_34 = arith.constant 0 : index
    %c0_35 = arith.constant 0 : index
    %25 = vector.load %arg26[%c0_34, %c0_35] : memref<64x32xf32, #tpu.memory_space<vmem>>, vector<8x32xf32>
    %cst_36 = arith.constant dense<0.000000e+00> : vector<8x32xf32>
    %26 = tpu.matmul %20, %14, %cst_36 {dimension_numbers = #tpu.dot_dimension_numbers<[1], [0], [0], [1], [0, 0, 1, 1], [], []>} : vector<8x32xf32>, vector<32x32xf32>, vector<8x32xf32> -> vector<8x32xf32>
    %27 = arith.addf %24, %26 : vector<8x32xf32>
    %28 = math.tanh %27 : vector<8x32xf32>
    %cst_37 = arith.constant dense<0.000000e+00> : vector<8x32xf32>
    %29 = tpu.matmul %22, %17, %cst_37 {dimension_numbers = #tpu.dot_dimension_numbers<[1], [0], [0], [1], [0, 0, 1, 1], [], []>} : vector<8x32xf32>, vector<32x32xf32>, vector<8x32xf32> -> vector<8x32xf32>
    %30 = arith.addf %25, %29 : vector<8x32xf32>
    %31 = math.tanh %30 : vector<8x32xf32>
    %32 = tpu.concatenate %28, %21 in 1 : vector<8x32xf32>, vector<8x32xf32> -> vector<8x64xf32>
    %cst_38 = arith.constant dense<0.000000e+00> : vector<8x32xf32>
    %33 = tpu.matmul %32, %15, %cst_38 {dimension_numbers = #tpu.dot_dimension_numbers<[1], [0], [0], [1], [0, 0, 1, 1], [], []>} : vector<8x64xf32>, vector<64x32xf32>, vector<8x32xf32> -> vector<8x32xf32>
    %34 = vector.broadcast %16 : vector<1x32xf32> to vector<8x32xf32>
    %35 = arith.addf %33, %34 : vector<8x32xf32>
    %36 = math.tanh %35 : vector<8x32xf32>
    %37 = tpu.concatenate %31, %23 in 1 : vector<8x32xf32>, vector<8x32xf32> -> vector<8x64xf32>
    %cst_39 = arith.constant dense<0.000000e+00> : vector<8x32xf32>
    %38 = tpu.matmul %37, %18, %cst_39 {dimension_numbers = #tpu.dot_dimension_numbers<[1], [0], [0], [1], [0, 0, 1, 1], [], []>} : vector<8x64xf32>, vector<64x32xf32>, vector<8x32xf32> -> vector<8x32xf32>
    %39 = vector.broadcast %19 : vector<1x32xf32> to vector<8x32xf32>
    %40 = arith.addf %38, %39 : vector<8x32xf32>
    %41 = math.tanh %40 : vector<8x32xf32>
    %c8 = arith.constant 8 : index
    %c0_40 = arith.constant 0 : index
    %42 = vector.load %arg25[%c8, %c0_40] : memref<64x32xf32, #tpu.memory_space<vmem>>, vector<8x32xf32>
    %c8_41 = arith.constant 8 : index
    %c0_42 = arith.constant 0 : index
    %43 = vector.load %arg26[%c8_41, %c0_42] : memref<64x32xf32, #tpu.memory_space<vmem>>, vector<8x32xf32>
    %cst_43 = arith.constant dense<0.000000e+00> : vector<8x32xf32>
    %44 = tpu.matmul %28, %14, %cst_43 {dimension_numbers = #tpu.dot_dimension_numbers<[1], [0], [0], [1], [0, 0, 1, 1], [], []>} : vector<8x32xf32>, vector<32x32xf32>, vector<8x32xf32> -> vector<8x32xf32>
    %45 = arith.addf %42, %44 : vector<8x32xf32>
    %46 = math.tanh %45 : vector<8x32xf32>
    %cst_44 = arith.constant dense<0.000000e+00> : vector<8x32xf32>
    %47 = tpu.matmul %31, %17, %cst_44 {dimension_numbers = #tpu.dot_dimension_numbers<[1], [0], [0], [1], [0, 0, 1, 1], [], []>} : vector<8x32xf32>, vector<32x32xf32>, vector<8x32xf32> -> vector<8x32xf32>
    %48 = arith.addf %43, %47 : vector<8x32xf32>
    %49 = math.tanh %48 : vector<8x32xf32>
    %50 = tpu.concatenate %46, %36 in 1 : vector<8x32xf32>, vector<8x32xf32> -> vector<8x64xf32>
    %cst_45 = arith.constant dense<0.000000e+00> : vector<8x32xf32>
    %51 = tpu.matmul %50, %15, %cst_45 {dimension_numbers = #tpu.dot_dimension_numbers<[1], [0], [0], [1], [0, 0, 1, 1], [], []>} : vector<8x64xf32>, vector<64x32xf32>, vector<8x32xf32> -> vector<8x32xf32>
    %52 = vector.broadcast %16 : vector<1x32xf32> to vector<8x32xf32>
    %53 = arith.addf %51, %52 : vector<8x32xf32>
    %54 = math.tanh %53 : vector<8x32xf32>
    %55 = tpu.concatenate %49, %41 in 1 : vector<8x32xf32>, vector<8x32xf32> -> vector<8x64xf32>
    %cst_46 = arith.constant dense<0.000000e+00> : vector<8x32xf32>
    %56 = tpu.matmul %55, %18, %cst_46 {dimension_numbers = #tpu.dot_dimension_numbers<[1], [0], [0], [1], [0, 0, 1, 1], [], []>} : vector<8x64xf32>, vector<64x32xf32>, vector<8x32xf32> -> vector<8x32xf32>
    %57 = vector.broadcast %19 : vector<1x32xf32> to vector<8x32xf32>
    %58 = arith.addf %56, %57 : vector<8x32xf32>
    %59 = math.tanh %58 : vector<8x32xf32>
    %c16 = arith.constant 16 : index
    %c0_47 = arith.constant 0 : index
    %60 = vector.load %arg25[%c16, %c0_47] : memref<64x32xf32, #tpu.memory_space<vmem>>, vector<8x32xf32>
    %c16_48 = arith.constant 16 : index
    %c0_49 = arith.constant 0 : index
    %61 = vector.load %arg26[%c16_48, %c0_49] : memref<64x32xf32, #tpu.memory_space<vmem>>, vector<8x32xf32>
    %cst_50 = arith.constant dense<0.000000e+00> : vector<8x32xf32>
    %62 = tpu.matmul %46, %14, %cst_50 {dimension_numbers = #tpu.dot_dimension_numbers<[1], [0], [0], [1], [0, 0, 1, 1], [], []>} : vector<8x32xf32>, vector<32x32xf32>, vector<8x32xf32> -> vector<8x32xf32>
    %63 = arith.addf %60, %62 : vector<8x32xf32>
    %64 = math.tanh %63 : vector<8x32xf32>
    %cst_51 = arith.constant dense<0.000000e+00> : vector<8x32xf32>
    %65 = tpu.matmul %49, %17, %cst_51 {dimension_numbers = #tpu.dot_dimension_numbers<[1], [0], [0], [1], [0, 0, 1, 1], [], []>} : vector<8x32xf32>, vector<32x32xf32>, vector<8x32xf32> -> vector<8x32xf32>
    %66 = arith.addf %61, %65 : vector<8x32xf32>
    %67 = math.tanh %66 : vector<8x32xf32>
    %68 = tpu.concatenate %64, %54 in 1 : vector<8x32xf32>, vector<8x32xf32> -> vector<8x64xf32>
    %cst_52 = arith.constant dense<0.000000e+00> : vector<8x32xf32>
    %69 = tpu.matmul %68, %15, %cst_52 {dimension_numbers = #tpu.dot_dimension_numbers<[1], [0], [0], [1], [0, 0, 1, 1], [], []>} : vector<8x64xf32>, vector<64x32xf32>, vector<8x32xf32> -> vector<8x32xf32>
    %70 = vector.broadcast %16 : vector<1x32xf32> to vector<8x32xf32>
    %71 = arith.addf %69, %70 : vector<8x32xf32>
    %72 = math.tanh %71 : vector<8x32xf32>
    %73 = tpu.concatenate %67, %59 in 1 : vector<8x32xf32>, vector<8x32xf32> -> vector<8x64xf32>
    %cst_53 = arith.constant dense<0.000000e+00> : vector<8x32xf32>
    %74 = tpu.matmul %73, %18, %cst_53 {dimension_numbers = #tpu.dot_dimension_numbers<[1], [0], [0], [1], [0, 0, 1, 1], [], []>} : vector<8x64xf32>, vector<64x32xf32>, vector<8x32xf32> -> vector<8x32xf32>
    %75 = vector.broadcast %19 : vector<1x32xf32> to vector<8x32xf32>
    %76 = arith.addf %74, %75 : vector<8x32xf32>
    %77 = math.tanh %76 : vector<8x32xf32>
    %c24 = arith.constant 24 : index
    %c0_54 = arith.constant 0 : index
    %78 = vector.load %arg25[%c24, %c0_54] : memref<64x32xf32, #tpu.memory_space<vmem>>, vector<8x32xf32>
    %c24_55 = arith.constant 24 : index
    %c0_56 = arith.constant 0 : index
    %79 = vector.load %arg26[%c24_55, %c0_56] : memref<64x32xf32, #tpu.memory_space<vmem>>, vector<8x32xf32>
    %cst_57 = arith.constant dense<0.000000e+00> : vector<8x32xf32>
    %80 = tpu.matmul %64, %14, %cst_57 {dimension_numbers = #tpu.dot_dimension_numbers<[1], [0], [0], [1], [0, 0, 1, 1], [], []>} : vector<8x32xf32>, vector<32x32xf32>, vector<8x32xf32> -> vector<8x32xf32>
    %81 = arith.addf %78, %80 : vector<8x32xf32>
    %82 = math.tanh %81 : vector<8x32xf32>
    %cst_58 = arith.constant dense<0.000000e+00> : vector<8x32xf32>
    %83 = tpu.matmul %67, %17, %cst_58 {dimension_numbers = #tpu.dot_dimension_numbers<[1], [0], [0], [1], [0, 0, 1, 1], [], []>} : vector<8x32xf32>, vector<32x32xf32>, vector<8x32xf32> -> vector<8x32xf32>
    %84 = arith.addf %79, %83 : vector<8x32xf32>
    %85 = math.tanh %84 : vector<8x32xf32>
    %86 = tpu.concatenate %82, %72 in 1 : vector<8x32xf32>, vector<8x32xf32> -> vector<8x64xf32>
    %cst_59 = arith.constant dense<0.000000e+00> : vector<8x32xf32>
    %87 = tpu.matmul %86, %15, %cst_59 {dimension_numbers = #tpu.dot_dimension_numbers<[1], [0], [0], [1], [0, 0, 1, 1], [], []>} : vector<8x64xf32>, vector<64x32xf32>, vector<8x32xf32> -> vector<8x32xf32>
    %88 = vector.broadcast %16 : vector<1x32xf32> to vector<8x32xf32>
    %89 = arith.addf %87, %88 : vector<8x32xf32>
    %90 = math.tanh %89 : vector<8x32xf32>
    %91 = tpu.concatenate %85, %77 in 1 : vector<8x32xf32>, vector<8x32xf32> -> vector<8x64xf32>
    %cst_60 = arith.constant dense<0.000000e+00> : vector<8x32xf32>
    %92 = tpu.matmul %91, %18, %cst_60 {dimension_numbers = #tpu.dot_dimension_numbers<[1], [0], [0], [1], [0, 0, 1, 1], [], []>} : vector<8x64xf32>, vector<64x32xf32>, vector<8x32xf32> -> vector<8x32xf32>
    %93 = vector.broadcast %19 : vector<1x32xf32> to vector<8x32xf32>
    %94 = arith.addf %92, %93 : vector<8x32xf32>
    %95 = math.tanh %94 : vector<8x32xf32>
    %c32 = arith.constant 32 : index
    %c0_61 = arith.constant 0 : index
    %96 = vector.load %arg25[%c32, %c0_61] : memref<64x32xf32, #tpu.memory_space<vmem>>, vector<8x32xf32>
    %c32_62 = arith.constant 32 : index
    %c0_63 = arith.constant 0 : index
    %97 = vector.load %arg26[%c32_62, %c0_63] : memref<64x32xf32, #tpu.memory_space<vmem>>, vector<8x32xf32>
    %cst_64 = arith.constant dense<0.000000e+00> : vector<8x32xf32>
    %98 = tpu.matmul %82, %14, %cst_64 {dimension_numbers = #tpu.dot_dimension_numbers<[1], [0], [0], [1], [0, 0, 1, 1], [], []>} : vector<8x32xf32>, vector<32x32xf32>, vector<8x32xf32> -> vector<8x32xf32>
    %99 = arith.addf %96, %98 : vector<8x32xf32>
    %100 = math.tanh %99 : vector<8x32xf32>
    %cst_65 = arith.constant dense<0.000000e+00> : vector<8x32xf32>
    %101 = tpu.matmul %85, %17, %cst_65 {dimension_numbers = #tpu.dot_dimension_numbers<[1], [0], [0], [1], [0, 0, 1, 1], [], []>} : vector<8x32xf32>, vector<32x32xf32>, vector<8x32xf32> -> vector<8x32xf32>
    %102 = arith.addf %97, %101 : vector<8x32xf32>
    %103 = math.tanh %102 : vector<8x32xf32>
    %104 = tpu.concatenate %100, %90 in 1 : vector<8x32xf32>, vector<8x32xf32> -> vector<8x64xf32>
    %cst_66 = arith.constant dense<0.000000e+00> : vector<8x32xf32>
    %105 = tpu.matmul %104, %15, %cst_66 {dimension_numbers = #tpu.dot_dimension_numbers<[1], [0], [0], [1], [0, 0, 1, 1], [], []>} : vector<8x64xf32>, vector<64x32xf32>, vector<8x32xf32> -> vector<8x32xf32>
    %106 = vector.broadcast %16 : vector<1x32xf32> to vector<8x32xf32>
    %107 = arith.addf %105, %106 : vector<8x32xf32>
    %108 = math.tanh %107 : vector<8x32xf32>
    %109 = tpu.concatenate %103, %95 in 1 : vector<8x32xf32>, vector<8x32xf32> -> vector<8x64xf32>
    %cst_67 = arith.constant dense<0.000000e+00> : vector<8x32xf32>
    %110 = tpu.matmul %109, %18, %cst_67 {dimension_numbers = #tpu.dot_dimension_numbers<[1], [0], [0], [1], [0, 0, 1, 1], [], []>} : vector<8x64xf32>, vector<64x32xf32>, vector<8x32xf32> -> vector<8x32xf32>
    %111 = vector.broadcast %19 : vector<1x32xf32> to vector<8x32xf32>
    %112 = arith.addf %110, %111 : vector<8x32xf32>
    %113 = math.tanh %112 : vector<8x32xf32>
    %c40 = arith.constant 40 : index
    %c0_68 = arith.constant 0 : index
    %114 = vector.load %arg25[%c40, %c0_68] : memref<64x32xf32, #tpu.memory_space<vmem>>, vector<8x32xf32>
    %c40_69 = arith.constant 40 : index
    %c0_70 = arith.constant 0 : index
    %115 = vector.load %arg26[%c40_69, %c0_70] : memref<64x32xf32, #tpu.memory_space<vmem>>, vector<8x32xf32>
    %cst_71 = arith.constant dense<0.000000e+00> : vector<8x32xf32>
    %116 = tpu.matmul %100, %14, %cst_71 {dimension_numbers = #tpu.dot_dimension_numbers<[1], [0], [0], [1], [0, 0, 1, 1], [], []>} : vector<8x32xf32>, vector<32x32xf32>, vector<8x32xf32> -> vector<8x32xf32>
    %117 = arith.addf %114, %116 : vector<8x32xf32>
    %118 = math.tanh %117 : vector<8x32xf32>
    %cst_72 = arith.constant dense<0.000000e+00> : vector<8x32xf32>
    %119 = tpu.matmul %103, %17, %cst_72 {dimension_numbers = #tpu.dot_dimension_numbers<[1], [0], [0], [1], [0, 0, 1, 1], [], []>} : vector<8x32xf32>, vector<32x32xf32>, vector<8x32xf32> -> vector<8x32xf32>
    %120 = arith.addf %115, %119 : vector<8x32xf32>
    %121 = math.tanh %120 : vector<8x32xf32>
    %122 = tpu.concatenate %118, %108 in 1 : vector<8x32xf32>, vector<8x32xf32> -> vector<8x64xf32>
    %cst_73 = arith.constant dense<0.000000e+00> : vector<8x32xf32>
    %123 = tpu.matmul %122, %15, %cst_73 {dimension_numbers = #tpu.dot_dimension_numbers<[1], [0], [0], [1], [0, 0, 1, 1], [], []>} : vector<8x64xf32>, vector<64x32xf32>, vector<8x32xf32> -> vector<8x32xf32>
    %124 = vector.broadcast %16 : vector<1x32xf32> to vector<8x32xf32>
    %125 = arith.addf %123, %124 : vector<8x32xf32>
    %126 = math.tanh %125 : vector<8x32xf32>
    %127 = tpu.concatenate %121, %113 in 1 : vector<8x32xf32>, vector<8x32xf32> -> vector<8x64xf32>
    %cst_74 = arith.constant dense<0.000000e+00> : vector<8x32xf32>
    %128 = tpu.matmul %127, %18, %cst_74 {dimension_numbers = #tpu.dot_dimension_numbers<[1], [0], [0], [1], [0, 0, 1, 1], [], []>} : vector<8x64xf32>, vector<64x32xf32>, vector<8x32xf32> -> vector<8x32xf32>
    %129 = vector.broadcast %19 : vector<1x32xf32> to vector<8x32xf32>
    %130 = arith.addf %128, %129 : vector<8x32xf32>
    %131 = math.tanh %130 : vector<8x32xf32>
    %c48 = arith.constant 48 : index
    %c0_75 = arith.constant 0 : index
    %132 = vector.load %arg25[%c48, %c0_75] : memref<64x32xf32, #tpu.memory_space<vmem>>, vector<8x32xf32>
    %c48_76 = arith.constant 48 : index
    %c0_77 = arith.constant 0 : index
    %133 = vector.load %arg26[%c48_76, %c0_77] : memref<64x32xf32, #tpu.memory_space<vmem>>, vector<8x32xf32>
    %cst_78 = arith.constant dense<0.000000e+00> : vector<8x32xf32>
    %134 = tpu.matmul %118, %14, %cst_78 {dimension_numbers = #tpu.dot_dimension_numbers<[1], [0], [0], [1], [0, 0, 1, 1], [], []>} : vector<8x32xf32>, vector<32x32xf32>, vector<8x32xf32> -> vector<8x32xf32>
    %135 = arith.addf %132, %134 : vector<8x32xf32>
    %136 = math.tanh %135 : vector<8x32xf32>
    %cst_79 = arith.constant dense<0.000000e+00> : vector<8x32xf32>
    %137 = tpu.matmul %121, %17, %cst_79 {dimension_numbers = #tpu.dot_dimension_numbers<[1], [0], [0], [1], [0, 0, 1, 1], [], []>} : vector<8x32xf32>, vector<32x32xf32>, vector<8x32xf32> -> vector<8x32xf32>
    %138 = arith.addf %133, %137 : vector<8x32xf32>
    %139 = math.tanh %138 : vector<8x32xf32>
    %140 = tpu.concatenate %136, %126 in 1 : vector<8x32xf32>, vector<8x32xf32> -> vector<8x64xf32>
    %cst_80 = arith.constant dense<0.000000e+00> : vector<8x32xf32>
    %141 = tpu.matmul %140, %15, %cst_80 {dimension_numbers = #tpu.dot_dimension_numbers<[1], [0], [0], [1], [0, 0, 1, 1], [], []>} : vector<8x64xf32>, vector<64x32xf32>, vector<8x32xf32> -> vector<8x32xf32>
    %142 = vector.broadcast %16 : vector<1x32xf32> to vector<8x32xf32>
    %143 = arith.addf %141, %142 : vector<8x32xf32>
    %144 = math.tanh %143 : vector<8x32xf32>
    %145 = tpu.concatenate %139, %131 in 1 : vector<8x32xf32>, vector<8x32xf32> -> vector<8x64xf32>
    %cst_81 = arith.constant dense<0.000000e+00> : vector<8x32xf32>
    %146 = tpu.matmul %145, %18, %cst_81 {dimension_numbers = #tpu.dot_dimension_numbers<[1], [0], [0], [1], [0, 0, 1, 1], [], []>} : vector<8x64xf32>, vector<64x32xf32>, vector<8x32xf32> -> vector<8x32xf32>
    %147 = vector.broadcast %19 : vector<1x32xf32> to vector<8x32xf32>
    %148 = arith.addf %146, %147 : vector<8x32xf32>
    %149 = math.tanh %148 : vector<8x32xf32>
    %c56 = arith.constant 56 : index
    %c0_82 = arith.constant 0 : index
    %150 = vector.load %arg25[%c56, %c0_82] : memref<64x32xf32, #tpu.memory_space<vmem>>, vector<8x32xf32>
    %c56_83 = arith.constant 56 : index
    %c0_84 = arith.constant 0 : index
    %151 = vector.load %arg26[%c56_83, %c0_84] : memref<64x32xf32, #tpu.memory_space<vmem>>, vector<8x32xf32>
    %cst_85 = arith.constant dense<0.000000e+00> : vector<8x32xf32>
    %152 = tpu.matmul %136, %14, %cst_85 {dimension_numbers = #tpu.dot_dimension_numbers<[1], [0], [0], [1], [0, 0, 1, 1], [], []>} : vector<8x32xf32>, vector<32x32xf32>, vector<8x32xf32> -> vector<8x32xf32>
    %153 = arith.addf %150, %152 : vector<8x32xf32>
    %154 = math.tanh %153 : vector<8x32xf32>
    %cst_86 = arith.constant dense<0.000000e+00> : vector<8x32xf32>
    %155 = tpu.matmul %139, %17, %cst_86 {dimension_numbers = #tpu.dot_dimension_numbers<[1], [0], [0], [1], [0, 0, 1, 1], [], []>} : vector<8x32xf32>, vector<32x32xf32>, vector<8x32xf32> -> vector<8x32xf32>
    %156 = arith.addf %151, %155 : vector<8x32xf32>
    %157 = math.tanh %156 : vector<8x32xf32>
    %158 = tpu.concatenate %154, %144 in 1 : vector<8x32xf32>, vector<8x32xf32> -> vector<8x64xf32>
    %cst_87 = arith.constant dense<0.000000e+00> : vector<8x32xf32>
    %159 = tpu.matmul %158, %15, %cst_87 {dimension_numbers = #tpu.dot_dimension_numbers<[1], [0], [0], [1], [0, 0, 1, 1], [], []>} : vector<8x64xf32>, vector<64x32xf32>, vector<8x32xf32> -> vector<8x32xf32>
    %160 = vector.broadcast %16 : vector<1x32xf32> to vector<8x32xf32>
    %161 = arith.addf %159, %160 : vector<8x32xf32>
    %162 = math.tanh %161 : vector<8x32xf32>
    %163 = tpu.concatenate %157, %149 in 1 : vector<8x32xf32>, vector<8x32xf32> -> vector<8x64xf32>
    %cst_88 = arith.constant dense<0.000000e+00> : vector<8x32xf32>
    %164 = tpu.matmul %163, %18, %cst_88 {dimension_numbers = #tpu.dot_dimension_numbers<[1], [0], [0], [1], [0, 0, 1, 1], [], []>} : vector<8x64xf32>, vector<64x32xf32>, vector<8x32xf32> -> vector<8x32xf32>
    %165 = vector.broadcast %19 : vector<1x32xf32> to vector<8x32xf32>
    %166 = arith.addf %164, %165 : vector<8x32xf32>
    %167 = math.tanh %166 : vector<8x32xf32>
    %c0_89 = arith.constant 0 : index
    %c0_90 = arith.constant 0 : index
    %168 = vector.load %arg7[%c0_89, %c0_90] : memref<1x32xf32, #tpu.memory_space<vmem>>, vector<1x32xf32>
    %c0_91 = arith.constant 0 : index
    %c0_92 = arith.constant 0 : index
    %169 = vector.load %arg8[%c0_91, %c0_92] : memref<1x32xf32, #tpu.memory_space<vmem>>, vector<1x32xf32>
    %cst_93 = arith.constant dense<0.000000e+00> : vector<8xf32>
    %170 = vector.multi_reduction <add>, %162, %cst_93 [1] : vector<8x32xf32> to vector<8xf32>
    %171 = vector.shape_cast %170 : vector<8xf32> to vector<8x1xf32>
    %cst_94 = arith.constant 3.200000e+01 : f32
    %172 = vector.broadcast %cst_94 : f32 to vector<8x1xf32>
    %173 = arith.divf %171, %172 : vector<8x1xf32>
    %174 = vector.broadcast %173 : vector<8x1xf32> to vector<8x32xf32>
    %175 = arith.subf %162, %174 : vector<8x32xf32>
    %176 = arith.mulf %175, %175 : vector<8x32xf32>
    %cst_95 = arith.constant dense<0.000000e+00> : vector<8xf32>
    %177 = vector.multi_reduction <add>, %176, %cst_95 [1] : vector<8x32xf32> to vector<8xf32>
    %178 = vector.shape_cast %177 : vector<8xf32> to vector<8x1xf32>
    %cst_96 = arith.constant 3.200000e+01 : f32
    %179 = vector.broadcast %cst_96 : f32 to vector<8x1xf32>
    %180 = arith.divf %178, %179 : vector<8x1xf32>
    %cst_97 = arith.constant 9.99999974E-6 : f32
    %181 = vector.broadcast %cst_97 : f32 to vector<8x1xf32>
    %182 = arith.addf %180, %181 : vector<8x1xf32>
    %183 = math.rsqrt %182 : vector<8x1xf32>
    %184 = vector.broadcast %183 : vector<8x1xf32> to vector<8x32xf32>
    %185 = arith.mulf %175, %184 : vector<8x32xf32>
    %186 = vector.broadcast %168 : vector<1x32xf32> to vector<8x32xf32>
    %187 = arith.mulf %185, %186 : vector<8x32xf32>
    %188 = vector.broadcast %169 : vector<1x32xf32> to vector<8x32xf32>
    %189 = arith.addf %187, %188 : vector<8x32xf32>
    %c0_98 = arith.constant 0 : index
    %c0_99 = arith.constant 0 : index
    %190 = vector.load %arg9[%c0_98, %c0_99] : memref<32x6xf32, #tpu.memory_space<vmem>>, vector<32x6xf32>
    %cst_100 = arith.constant dense<0.000000e+00> : vector<8x6xf32>
    %191 = tpu.matmul %189, %190, %cst_100 {dimension_numbers = #tpu.dot_dimension_numbers<[1], [0], [0], [1], [0, 0, 1, 1], [], []>} : vector<8x32xf32>, vector<32x6xf32>, vector<8x6xf32> -> vector<8x6xf32>
    %c0_101 = arith.constant 0 : index
    %c0_102 = arith.constant 0 : index
    %192 = vector.load %arg10[%c0_101, %c0_102] : memref<1x6xf32, #tpu.memory_space<vmem>>, vector<1x6xf32>
    %193 = vector.broadcast %192 : vector<1x6xf32> to vector<8x6xf32>
    %194 = arith.addf %191, %193 : vector<8x6xf32>
    %cst_103 = arith.constant dense<0xFF800000> : vector<8xf32>
    %195 = vector.multi_reduction <maximumf>, %194, %cst_103 [1] : vector<8x6xf32> to vector<8xf32>
    %196 = vector.shape_cast %195 : vector<8xf32> to vector<8x1xf32>
    %197 = vector.broadcast %196 : vector<8x1xf32> to vector<8x6xf32>
    %198 = arith.subf %194, %197 : vector<8x6xf32>
    %199 = math.exp %198 : vector<8x6xf32>
    %cst_104 = arith.constant dense<0.000000e+00> : vector<8xf32>
    %200 = vector.multi_reduction <add>, %199, %cst_104 [1] : vector<8x6xf32> to vector<8xf32>
    %201 = vector.shape_cast %200 : vector<8xf32> to vector<8x1xf32>
    %202 = tpu.reciprocal %201 {approx = true} : vector<8x1xf32> -> vector<8x1xf32>
    %203 = vector.broadcast %202 : vector<8x1xf32> to vector<8x6xf32>
    %204 = arith.mulf %199, %203 : vector<8x6xf32>
    %c0_105 = arith.constant 0 : index
    %c0_106 = arith.constant 0 : index
    %205 = vector.load %arg16[%c0_105, %c0_106] : memref<1x32xf32, #tpu.memory_space<vmem>>, vector<1x32xf32>
    %c0_107 = arith.constant 0 : index
    %c0_108 = arith.constant 0 : index
    %206 = vector.load %arg17[%c0_107, %c0_108] : memref<1x32xf32, #tpu.memory_space<vmem>>, vector<1x32xf32>
    %cst_109 = arith.constant dense<0.000000e+00> : vector<8xf32>
    %207 = vector.multi_reduction <add>, %167, %cst_109 [1] : vector<8x32xf32> to vector<8xf32>
    %208 = vector.shape_cast %207 : vector<8xf32> to vector<8x1xf32>
    %cst_110 = arith.constant 3.200000e+01 : f32
    %209 = vector.broadcast %cst_110 : f32 to vector<8x1xf32>
    %210 = arith.divf %208, %209 : vector<8x1xf32>
    %211 = vector.broadcast %210 : vector<8x1xf32> to vector<8x32xf32>
    %212 = arith.subf %167, %211 : vector<8x32xf32>
    %213 = arith.mulf %212, %212 : vector<8x32xf32>
    %cst_111 = arith.constant dense<0.000000e+00> : vector<8xf32>
    %214 = vector.multi_reduction <add>, %213, %cst_111 [1] : vector<8x32xf32> to vector<8xf32>
    %215 = vector.shape_cast %214 : vector<8xf32> to vector<8x1xf32>
    %cst_112 = arith.constant 3.200000e+01 : f32
    %216 = vector.broadcast %cst_112 : f32 to vector<8x1xf32>
    %217 = arith.divf %215, %216 : vector<8x1xf32>
    %cst_113 = arith.constant 9.99999974E-6 : f32
    %218 = vector.broadcast %cst_113 : f32 to vector<8x1xf32>
    %219 = arith.addf %217, %218 : vector<8x1xf32>
    %220 = math.rsqrt %219 : vector<8x1xf32>
    %221 = vector.broadcast %220 : vector<8x1xf32> to vector<8x32xf32>
    %222 = arith.mulf %212, %221 : vector<8x32xf32>
    %223 = vector.broadcast %205 : vector<1x32xf32> to vector<8x32xf32>
    %224 = arith.mulf %222, %223 : vector<8x32xf32>
    %225 = vector.broadcast %206 : vector<1x32xf32> to vector<8x32xf32>
    %226 = arith.addf %224, %225 : vector<8x32xf32>
    %c0_114 = arith.constant 0 : index
    %c0_115 = arith.constant 0 : index
    %227 = vector.load %arg18[%c0_114, %c0_115] : memref<32x32xf32, #tpu.memory_space<vmem>>, vector<32x32xf32>
    %cst_116 = arith.constant dense<0.000000e+00> : vector<8x32xf32>
    %228 = tpu.matmul %226, %227, %cst_116 {dimension_numbers = #tpu.dot_dimension_numbers<[1], [0], [0], [1], [0, 0, 1, 1], [], []>} : vector<8x32xf32>, vector<32x32xf32>, vector<8x32xf32> -> vector<8x32xf32>
    %c0_117 = arith.constant 0 : index
    %c0_118 = arith.constant 0 : index
    %229 = vector.load %arg19[%c0_117, %c0_118] : memref<6x32xf32, #tpu.memory_space<vmem>>, vector<6x32xf32>
    %cst_119 = arith.constant dense<0.000000e+00> : vector<8x32xf32>
    %230 = tpu.matmul %194, %229, %cst_119 {dimension_numbers = #tpu.dot_dimension_numbers<[1], [0], [0], [1], [0, 0, 1, 1], [], []>} : vector<8x6xf32>, vector<6x32xf32>, vector<8x32xf32> -> vector<8x32xf32>
    %231 = arith.addf %228, %230 : vector<8x32xf32>
    %c0_120 = arith.constant 0 : index
    %c0_121 = arith.constant 0 : index
    %232 = vector.load %arg20[%c0_120, %c0_121] : memref<1x32xf32, #tpu.memory_space<vmem>>, vector<1x32xf32>
    %233 = vector.broadcast %232 : vector<1x32xf32> to vector<8x32xf32>
    %234 = arith.addf %231, %233 : vector<8x32xf32>
    %cst_122 = arith.constant 0.000000e+00 : f32
    %235 = vector.broadcast %cst_122 : f32 to vector<8x32xf32>
    %236 = arith.maximumf %234, %235 : vector<8x32xf32>
    %c0_123 = arith.constant 0 : index
    %c0_124 = arith.constant 0 : index
    %237 = vector.load %arg21[%c0_123, %c0_124] : memref<32x6xf32, #tpu.memory_space<vmem>>, vector<32x6xf32>
    %cst_125 = arith.constant dense<0.000000e+00> : vector<8x6xf32>
    %238 = tpu.matmul %236, %237, %cst_125 {dimension_numbers = #tpu.dot_dimension_numbers<[1], [0], [0], [1], [0, 0, 1, 1], [], []>} : vector<8x32xf32>, vector<32x6xf32>, vector<8x6xf32> -> vector<8x6xf32>
    %c0_126 = arith.constant 0 : index
    %c0_127 = arith.constant 0 : index
    %239 = vector.load %arg22[%c0_126, %c0_127] : memref<1x6xf32, #tpu.memory_space<vmem>>, vector<1x6xf32>
    %240 = vector.broadcast %239 : vector<1x6xf32> to vector<8x6xf32>
    %241 = arith.addf %238, %240 : vector<8x6xf32>
    %cst_128 = arith.constant dense<0xFF800000> : vector<8xf32>
    %242 = vector.multi_reduction <maximumf>, %241, %cst_128 [1] : vector<8x6xf32> to vector<8xf32>
    %243 = vector.shape_cast %242 : vector<8xf32> to vector<8x1xf32>
    %244 = vector.broadcast %243 : vector<8x1xf32> to vector<8x6xf32>
    %245 = arith.subf %241, %244 : vector<8x6xf32>
    %246 = math.exp %245 : vector<8x6xf32>
    %cst_129 = arith.constant dense<0.000000e+00> : vector<8xf32>
    %247 = vector.multi_reduction <add>, %246, %cst_129 [1] : vector<8x6xf32> to vector<8xf32>
    %248 = vector.shape_cast %247 : vector<8xf32> to vector<8x1xf32>
    %249 = tpu.reciprocal %248 {approx = true} : vector<8x1xf32> -> vector<8x1xf32>
    %250 = vector.broadcast %249 : vector<8x1xf32> to vector<8x6xf32>
    %251 = arith.mulf %246, %250 : vector<8x6xf32>
    %c0_130 = arith.constant 0 : index
    %c0_131 = arith.constant 0 : index
    %252 = vector.load %arg23[%c0_130, %c0_131] : memref<8x6xf32, #tpu.memory_space<vmem>>, vector<8x6xf32>
    tpu.vector_store %arg23[%c0_130, %c0_131], %204 {strides = array<i32>} : memref<8x6xf32, #tpu.memory_space<vmem>>, vector<8x6xf32>,
    %253 = arith.mulf %251, %204 : vector<8x6xf32>
    %c0_132 = arith.constant 0 : index
    %c0_133 = arith.constant 0 : index
    %254 = vector.load %arg24[%c0_132, %c0_133] : memref<8x6xf32, #tpu.memory_space<vmem>>, vector<8x6xf32>
    tpu.vector_store %arg24[%c0_132, %c0_133], %253 {strides = array<i32>} : memref<8x6xf32, #tpu.memory_space<vmem>>, vector<8x6xf32>,
    return
  }
}

</mosaic_0001>

<bundles_post_ra>
// kernel: esf_forward.1
= control target key start
LH: loop header
LB: loop body
LE: loop exit
PB: predicated region body
PF: predicated region fallthrough
CT: control target
= control target key end

     0   :  { %vm92_vm0 = vcmask 64512   ;;  %v4588_v9 = vmov 0.0|0.0   ;;  %vm274_vm1 = vcmask 1044480   ;;  %vm249_vm2 = vcmask 171008   ;;  %s5352_s2 = inlined_call_operand.vmem [shape: f32[8,32], index: 2, kind: input, shape index: {}]   ;;  %s5353_s0 = inlined_call_operand.vmem [shape: f32[64,8], index: 0, kind: input, shape index: {}]   ;;  %s5354_s11 = inlined_call_operand.vmem [shape: f32[21,32], index: 11, kind: input, shape index: {}]   ;;  %s5355_s3 = inlined_call_operand.vmem [shape: f32[32,32], index: 3, kind: input, shape index: {}]   ;;  %s5356_s1 = inlined_call_operand.vmem [shape: f32[64,21], index: 1, kind: input, shape index: {}]   ;;  %s5357_s13 = inlined_call_operand.vmem [shape: f32[32,32], index: 13, kind: input, shape index: {}]   ;;  %s5358_s5 = inlined_call_operand.vmem [shape: f32[64,32], index: 5, kind: input, shape index: {}]   ;;  %s5359_s14 = inlined_call_operand.vmem [shape: f32[64,32], index: 14, kind: input, shape index: {}]   ;;  %s5360_s4 = inlined_call_operand.vmem [shape: f32[1,32], index: 4, kind: input, shape index: {}]   ;;  %s5361_s12 = inlined_call_operand.vmem [shape: f32[1,32], index: 12, kind: input, shape index: {}]   ;;  %s5362_s6 = inlined_call_operand.vmem [shape: f32[1,32], index: 6, kind: input, shape index: {}]   ;;  %s5363_s15 = inlined_call_operand.vmem [shape: f32[1,32], index: 15, kind: input, shape index: {}]   ;;  %s5364_s9 = inlined_call_operand.vmem [shape: f32[32,6], index: 9, kind: input, shape index: {}]   ;;  %s5365_s7 = inlined_call_operand.vmem [shape: f32[1,32], index: 7, kind: input, shape index: {}]   ;;  %s5366_s18 = inlined_call_operand.vmem [shape: f32[32,32], index: 18, kind: input, shape index: {}]   ;;  %s5367_s8 = inlined_call_operand.vmem [shape: f32[1,32], index: 8, kind: input, shape index: {}]   ;;  %s5368_s16 = inlined_call_operand.vmem [shape: f32[1,32], index: 16, kind: input, shape index: {}]   ;;  %s5369_s17 = inlined_call_operand.vmem [shape: f32[1,32], index: 17, kind: input, shape index: {}]   ;;  %s5370_s19 = inlined_call_operand.vmem [shape: f32[6,32], index: 19, kind: input, shape index: {}]   ;;  %s5371_s10 = inlined_call_operand.vmem [shape: f32[1,6], index: 10, kind: input, shape index: {}]   ;;  %s5372_s21 = inlined_call_operand.vmem [shape: f32[32,6], index: 21, kind: input, shape index: {}]   ;;  %s5373_s20 = inlined_call_operand.vmem [shape: f32[1,32], index: 20, kind: input, shape index: {}]   ;;  %s5374_s23 = inlined_call_operand.vmem [shape: f32[8,6], index: 23, kind: output, shape index: {0}]   ;;  %s5375_s22 = inlined_call_operand.vmem [shape: f32[1,6], index: 22, kind: input, shape index: {}]   ;;  %s5376_s24 = inlined_call_operand.vmem [shape: f32[8,6], index: 24, kind: output, shape index: {1}]  }
   0x1   :  { %5384 = sst [smem:[#allocation4_spill]] %s5352_s2  ;;  %vm4589_vm3 = vmmov 0   ;;  %v4590_v32 = vmov 0.0   ;;  %vm222_vm4 = vcmask 261120   ;;  %vm573_vm5 = vcmask 523264  }
   0x2   :  { %5385 = sst [smem:[#allocation5_spill]] %s5353_s0  ;;  %s5393_s27 = sld [smem:[#allocation4_spill]]  ;;  %vm3062_vm6 = vcmask 1045504   ;;  %vm3013_vm7 = vcmask 48128  }
   0x3   :  { %5386 = sst [smem:[#allocation6_spill]] %s5354_s11  ;;  %s5394_s11 = sld [smem:[#allocation5_spill]] }
   0x4   :  { %5387 = sst [smem:[#allocation7_spill]] %s5355_s3  ;;  %s5395_s3 = sld [smem:[#allocation6_spill]] }
   0x5   :  { %5388 = sst [smem:[#allocation8_spill]] %s5356_s1 }
   0x6   :  { %5389 = sst [smem:[#allocation9_spill]] %s5357_s13  ;;  %s5396_s13 = sld [smem:[#allocation7_spill]] }
   0x7   :  { %5390 = sst [smem:[#allocation10_spill]] %s5358_s5  ;;  %s5397_s25 = sld [smem:[#allocation8_spill]] }
   0x8   :  { %5391 = sst [smem:[#allocation11_spill]] %s5359_s14  ;;  %v84_v0 = vld [vmem:[%s5393_s27] sm:$0xff]  ;;  %s5399_s1 = sld [smem:[#allocation10_spill]] }
   0x9   :  { %5392 = sst [smem:[#allocation12_spill]] %s5360_s4  ;;  %v76_v1 = vld [vmem:[%s5394_s11] sm:$0xff]  ;;  %v77_v2 = vld [vmem:[%s5394_s11 + $0x8] sm:$0xff]  ;;  %3648 = vmatprep.subr.mxu0 %v84_v0  ;;  %v78_v8 = vld [vmem:[%s5394_s11 + $0x10] sm:$0xff]  ;;  %s5398_s4 = sld [smem:[#allocation9_spill]] }
   0xa   :  { %3650 = vmatprep.mubr.msk.f32.mxu0 %vm92_vm0, %v76_v1  ;;  %v239_v3 = vld [vmem:[%s5395_s3] sm:$0xff]  ;;  %v240_v4 = vld [vmem:[%s5395_s3 + $0x8] sm:$0xff]  ;;  %3649 = vmatpush3.msra.mxu0 %v84_v0  ;;  %v241_v11 = vld [vmem:[%s5395_s3 + $0x10] sm:$0x1f]  ;;  %s5400_s28 = sld [smem:[#allocation11_spill]] }
   0xb   :  { %v4198_v6 = vpack.c.bf16 %v240_v4, %v239_v3  ;;  %3651 = vmatmul.mubr.msk.f32.vlgmr.msra.gmra.mrb[0].mxu0 %vm92_vm0, %v77_v2  ;;  %4202 = vmatprep.subr.bf16.mxu0 %v4588_v9  ;;  %v79_v13 = vld [vmem:[%s5394_s11 + $0x18] sm:$0xff]  ;;  %v80_v14 = vld [vmem:[%s5394_s11 + $0x20] sm:$0xff]  ;;  %v81_v21 = vld [vmem:[%s5394_s11 + $0x28] sm:$0xff] }
   0xc   :  { %v391_v5 = vld [vmem:[%s5396_s13] sm:$0xff]  ;;  %v392_v7 = vld [vmem:[%s5396_s13 + $0x8] sm:$0xff]  ;;  %3653 = vmatprep.mubr.msk.f32.mxu0 %vm92_vm0, %v78_v8  ;;  %v393_v15 = vld [vmem:[%s5396_s13 + $0x10] sm:$0xff] }
   0xd   :  { %v4744_v10 = vpack.c.bf16 %v392_v7, %v391_v5  ;;  %v231_v12 = vld [vmem:[%s5397_s25] sm:$0xff]  ;;  %4199 = vmatprep.subr.bf16.mxu1 %v4198_v6  ;;  %v394_v16 = vld [vmem:[%s5396_s13 + $0x18] sm:$0xff]  ;;  %v232_v18 = vld [vmem:[%s5397_s25 + $0x8] sm:$0xff] }
   0xe   :  { %4201 = vmatpush3.bf16.msra.mxu1 %v4198_v6  ;;  %3668 = vmatprep.mubr.msk.f32.mxu1 %vm249_vm2, %v231_v12  ;;  %v4768_v17 = vpack.c.bf16 %v394_v16, %v393_v15  ;;  %v233_v22 = vld [vmem:[%s5397_s25 + $0x10] sm:$0xff]  ;;  %v234_v27 = vld [vmem:[%s5397_s25 + $0x18] sm:$0xff]  ;;  %v235_v29 = vld [vmem:[%s5397_s25 + $0x20] sm:$0xff] }
   0xf   :  { %4204 = vmatpush3.bf16.msra.mxu0 %v4744_v10  ;;  %3666 = vmatprep.subr.msk.mxu1 %vm274_vm1, %v241_v11  ;;  %v404_v19 = vld [vmem:[%s5398_s4] sm:$0xff]  ;;  %v405_v20 = vld [vmem:[%s5398_s4 + $0x8] sm:$0xff]  ;;  %v82_v24 = vld [vmem:[%s5394_s11 + $0x30] sm:$0xff] }
  0x10   :  { %3654 = vmatmul.mubr.msk.f32.gmra.mrb[2].mxu0 %vm92_vm0, %v79_v13  ;;  %4205 = vmatprep.subr.bf16.mxu0 %v4588_v9  ;;  %v4788_v23 = vpack.c.bf16 %v405_v20, %v404_v19  ;;  %v406_v25 = vld [vmem:[%s5398_s4 + $0x10] sm:$0xff]  ;;  %v407_v26 = vld [vmem:[%s5398_s4 + $0x18] sm:$0xff]  ;;  %v236_v31 = vld [vmem:[%s5397_s25 + $0x28] sm:$0xff]  ;;  %s5401_s4 = sld [smem:[#allocation12_spill]] }
  0x11   :  { %3656 = vmatprep.mubr.msk.f32.mxu0 %vm92_vm0, %v80_v14  ;;  %v83_v28 = vld [vmem:[%s5394_s11 + $0x38] sm:$0xff]  ;;  %v4816_v30 = vpack.c.bf16 %v407_v26, %v406_v25  ;;  %v237_v33 = vld [vmem:[%s5397_s25 + $0x30] sm:$0xff]  ;;  %v395_v35 = vld [vmem:[%s5399_s1] sm:$0xff] }
  0x12   :  { %3667 = vmatpush3.msk.msra.mxu1 %vm274_vm1, %v241_v11  ;;  %v238_v34 = vld [vmem:[%s5397_s25 + $0x38] sm:$0xff]  ;;  %v396_v36 = vld [vmem:[%s5399_s1 + $0x8] sm:$0xff]  ;;  %v397_v38 = vld [vmem:[%s5399_s1 + $0x10] sm:$0xff] }
  0x13   :  { %4207 = vmatpush3.bf16.msra.mxu0 %v4768_v17  ;;  %3669 = vmatmul.mubr.msk.f32.vlgmr.msra.gmra.mrb[0].mxu1 %vm249_vm2, %v232_v18  ;;  %v4853_v37 = vpack.c.bf16 %v396_v36, %v395_v35  ;;  %v398_v39 = vld [vmem:[%s5399_s1 + $0x18] sm:$0xff]  ;;  %v408_v41 = vld [vmem:[%s5400_s28] sm:$0xff]  ;;  %v409_v42 = vld [vmem:[%s5400_s28 + $0x8] sm:$0xff] }
  0x14   :  { %4208 = vmatprep.subr.bf16.mxu1 %v4588_v9  ;;  %3657 = vmatmul.mubr.msk.f32.gmra.mrb[4].mxu0 %vm92_vm0, %v81_v21  ;;  %v4863_v40 = vpack.c.bf16 %v398_v39, %v397_v38  ;;  %v4872_v43 = vpack.c.bf16 %v409_v42, %v408_v41  ;;  %v399_v44 = vld [vmem:[%s5399_s1 + $0x20] sm:$0xff]  ;;  %v400_v45 = vld [vmem:[%s5399_s1 + $0x28] sm:$0xff]  ;;  %v410_v47 = vld [vmem:[%s5400_s28 + $0x10] sm:$0xff] }
  0x15   :  { %3671 = vmatprep.mubr.msk.f32.mxu1 %vm249_vm2, %v233_v22  ;;  %3659 = vmatprep.mubr.msk.f32.mxu0 %vm92_vm0, %v82_v24  ;;  %v4882_v46 = vpack.c.bf16 %v400_v45, %v399_v44  ;;  %v411_v48 = vld [vmem:[%s5400_s28 + $0x18] sm:$0xff]  ;;  %v401_v50 = vld [vmem:[%s5399_s1 + $0x30] sm:$0xff]  ;;  %v412_v53 = vld [vmem:[%s5400_s28 + $0x20] sm:$0xff] }
  0x16   :  { %4210 = vmatpush3.bf16.msra.mxu1 %v4788_v23  ;;  %4214 = vmatprep.subr.bf16.mxu0 %v4588_v9  ;;  %v4892_v49 = vpack.c.bf16 %v411_v48, %v410_v47  ;;  %v402_v51 = vld [vmem:[%s5399_s1 + $0x38] sm:$0xff]  ;;  %v413_v54 = vld [vmem:[%s5400_s28 + $0x28] sm:$0xff]  ;;  %v414_v56 = vld [vmem:[%s5400_s28 + $0x30] sm:$0xff] }
  0x17   :  { %4211 = vmatprep.subr.bf16.mxu1 %v4588_v9  ;;  %3672 = vmatmul.mubr.msk.f32.gmra.mrb[2].mxu1 %vm249_vm2, %v234_v27  ;;  %v4902_v52 = vpack.c.bf16 %v402_v51, %v401_v50  ;;  %v4911_v55 = vpack.c.bf16 %v413_v54, %v412_v53  ;;  %v415_v57 = vld [vmem:[%s5400_s28 + $0x38] sm:$0xff]  ;;  %v3324_v59 = vld [vmem:[%s5401_s4] ss:$0 sm:$0xff] }
  0x18   :  { %3660 = vmatmul.mubr.msk.f32.gmra.mrb[6].mxu0 %vm92_vm0, %v83_v28  ;;  %3674 = vmatprep.mubr.msk.f32.mxu1 %vm249_vm2, %v235_v29  ;;  %v4923_v58 = vpack.c.bf16 %v415_v57, %v414_v56  ;;  %v3333_v4 = vld [vmem:[%s5361_s12] ss:$0 sm:$0xff] }
  0x19   :  { %3688 = vmatprep.mubr.msk.f32.mxu0 %vm4589_vm3, %v4590_v32  ;;  %v4990_v53 = vld [vmem:[%s5362_s6] ss:$0 sm:$0xff]  ;;  %s4591_s6 = smov 32  }
  0x1a   :  { %4213 = vmatpush3.bf16.msra.mxu1 %v4816_v30 }
  0x1b   :  { %4226 = vmatprep.subr.bf16.mxu1 %v4588_v9  ;;  %3675 = vmatmul.mubr.msk.f32.gmra.mrb[4].mxu1 %vm249_vm2, %v236_v31 }
  0x1c   :  { %3689 = vmatmul.mubr.f32.vlgmr.msra.gmra.mrb[8].mxu0 %v4590_v32  ;;  %3677 = vmatprep.mubr.msk.f32.mxu1 %vm249_vm2, %v237_v33 }
  0x1d   :  { %3718 = vmatprep.mubr.msk.f32.mxu0 %vm4589_vm3, %v4590_v32  ;;  %4216 = vmatpush3.bf16.msra.mxu0 %v4853_v37 }
  0x1e   :  { %4217 = vmatprep.subr.bf16.mxu0 %v4588_v9 }
  0x1f   :  { %3678 = vmatmul.mubr.msk.f32.gmra.mrb[6].mxu1 %vm249_vm2, %v238_v34 }
  0x20   :  { %3699 = vmatprep.mubr.msk.f32.mxu1 %vm4589_vm3, %v4590_v32 }
  0x21   :  { %4219 = vmatpush3.bf16.msra.mxu0 %v4863_v40 }
  0x22   :  { %4220 = vmatprep.subr.bf16.mxu0 %v4588_v9 }
  0x23   :  { %3700 = vmatmul.mubr.f32.vlgmr.msra.gmra.mrb[8].mxu1 %v4590_v32 }
  0x24   :  { %3737 = vmatprep.mubr.msk.f32.mxu1 %vm4589_vm3, %v4590_v32  ;;  %4228 = vmatpush3.bf16.msra.mxu1 %v4872_v43 }
  0x25   :  { %4229 = vmatprep.subr.bf16.mxu1 %v4588_v9  ;;  %4222 = vmatpush3.bf16.msra.mxu0 %v4882_v46 }
  0x26   :  { %4223 = vmatprep.subr.bf16.mxu0 %v4588_v9 }
  0x28   :  { %4231 = vmatpush3.bf16.msra.mxu1 %v4892_v49 }
  0x29   :  { %4232 = vmatprep.subr.bf16.mxu1 %v4588_v9  ;;  %4225 = vmatpush3.bf16.msra.mxu0 %v4902_v52 }
  0x2a   :  { %4238 = vmatprep.subr.bf16.mxu0 %v4588_v9 }
  0x2c   :  { %4234 = vmatpush3.bf16.msra.mxu1 %v4911_v55 }
  0x2d   :  { %4235 = vmatprep.subr.bf16.mxu1 %v4588_v9 }
  0x30   :  { %4237 = vmatpush3.bf16.msra.mxu1 %v4923_v58 }
  0x31   :  { %4244 = vmatprep.subr.bf16.mxu1 %v4588_v9 }
  0xde   :  { %v3652_v60 = vpop.f32.mrb[0].mxu0 }
  0xdf   :  { %v189_v61 = vadd.f32 %v3652_v60, %v3324_v59  ;;  %v183_v62 = vpop.f32.mrb[1].mxu0 }
  0xe0   :  { %v184_v63 = vadd.f32 %v3324_v59, %v183_v62 }
  0xe1   :  { %224 = vst.msk [vmem:[#allocation2 + $0x8] sm:$0xff] %vm222_vm4, %v189_v61 }
  0xe2   :  { %223 = vst.msk [vmem:[#allocation2] sm:$0xff] %vm222_vm4, %v184_v63 }
  0xe3   :  { %v3655_v0 = vpop.f32.mrb[2].mxu0 }
  0xe4   :  { %v199_v1 = vadd.f32 %v3655_v0, %v3324_v59  ;;  %v193_v2 = vpop.f32.mrb[3].mxu0 }
  0xe5   :  { %v194_v3 = vadd.f32 %v3324_v59, %v193_v2 }
  0xe6   :  { %226 = vst.msk [vmem:[#allocation2 + $0x18] sm:$0xff] %vm222_vm4, %v199_v1  ;;  %v3670_v5 = vpop.f32.mrb[0].mxu1 }
  0xe7   :  { %225 = vst.msk [vmem:[#allocation2 + $0x10] sm:$0xff] %vm222_vm4, %v194_v3  ;;  %v3658_v6 = vpop.f32.mrb[4].mxu0  ;;  %v350_v7 = vadd.f32 %v3670_v5, %v3333_v4  ;;  %v344_v8 = vpop.f32.mrb[1].mxu1 }
  0xe8   :  { %v209_v11 = vadd.f32 %v3658_v6, %v3324_v59  ;;  %v203_v12 = vpop.f32.mrb[5].mxu0  ;;  %v345_v13 = vadd.f32 %v3333_v4, %v344_v8  ;;  %v729_v5 = vld [vmem:[#allocation2 + $0x8] sm:$0xff] }
  0xe9   :  { %v204_v14 = vadd.f32 %v3324_v59, %v203_v12  ;;  %384 = vst.msk [vmem:[#allocation3 + $0x8] sm:$0xff] %vm222_vm4, %v350_v7  ;;  %v417_v26 = vld [vmem:[#allocation2] sm:$0xff] }
  0xea   :  { %228 = vst.msk [vmem:[#allocation2 + $0x28] sm:$0xff] %vm222_vm4, %v209_v11  ;;  %383 = vst.msk [vmem:[#allocation3] sm:$0xff] %vm222_vm4, %v345_v13  ;;  %v3673_v15 = vpop.f32.mrb[2].mxu1 }
  0xeb   :  { %227 = vst.msk [vmem:[#allocation2 + $0x20] sm:$0xff] %vm222_vm4, %v204_v14  ;;  %v3661_v16 = vpop.f32.mrb[6].mxu0  ;;  %v360_v18 = vadd.f32 %v3673_v15, %v3333_v4  ;;  %v354_v19 = vpop.f32.mrb[3].mxu1 }
  0xec   :  { %v219_v20 = vadd.f32 %v3661_v16, %v3324_v59  ;;  %v213_v21 = vpop.f32.mrb[7].mxu0  ;;  %v355_v22 = vadd.f32 %v3333_v4, %v354_v19 }
  0xed   :  { %v214_v24 = vadd.f32 %v3324_v59, %v213_v21  ;;  %386 = vst.msk [vmem:[#allocation3 + $0x18] sm:$0xff] %vm222_vm4, %v360_v18  ;;  %v4996_v59 = vld [vmem:[%s5363_s15] ss:$0 sm:$0xff] }
  0xee   :  { %230 = vst.msk [vmem:[#allocation2 + $0x38] sm:$0xff] %vm222_vm4, %v219_v20  ;;  %385 = vst.msk [vmem:[#allocation3 + $0x10] sm:$0xff] %vm222_vm4, %v355_v22  ;;  %v3676_v25 = vpop.f32.mrb[4].mxu1 }
  0xef   :  { %229 = vst.msk [vmem:[#allocation2 + $0x30] sm:$0xff] %vm222_vm4, %v214_v24  ;;  %v488_v27 = vpop.f32.mrb[8].mxu0  ;;  %v370_v28 = vadd.f32 %v3676_v25, %v3333_v4  ;;  %v364_v29 = vpop.f32.mrb[5].mxu1 }
  0xf0   :  { %v492_v31 = vadd.f32 %v488_v27, %v417_v26  ;;  %v3690_v33 = vpop.f32.mrb[9].mxu0  ;;  %v365_v34 = vadd.f32 %v3333_v4, %v364_v29  ;;  %v730_v7 = vld [vmem:[#allocation3 + $0x8] sm:$0xff] }
  0xf1   :  { %388 = vst.msk [vmem:[#allocation3 + $0x28] sm:$0xff] %vm222_vm4, %v370_v28  ;;  %v418_v41 = vld [vmem:[#allocation3] sm:$0xff]  ;;  %v1039_v33 = vld [vmem:[#allocation2 + $0x10] sm:$0xff] }
  0xf2   :  { %4512 = vtanh.f32 %v492_v31  ;;  %387 = vst.msk [vmem:[#allocation3 + $0x20] sm:$0xff] %vm222_vm4, %v365_v34  ;;  %v3679_v35 = vpop.f32.mrb[6].mxu1 }
  0xf3   :  { %v380_v36 = vadd.f32 %v3679_v35, %v3333_v4  ;;  %v374_v38 = vpop.f32.mrb[7].mxu1 }
  0xf4   :  { %v375_v39 = vadd.f32 %v3333_v4, %v374_v38 }
  0xf5   :  { %390 = vst.msk [vmem:[#allocation3 + $0x38] sm:$0xff] %vm222_vm4, %v380_v36  ;;  %v1040_v35 = vld [vmem:[#allocation3 + $0x10] sm:$0xff] }
  0xf6   :  { %389 = vst.msk [vmem:[#allocation3 + $0x30] sm:$0xff] %vm222_vm4, %v375_v39  ;;  %v560_v42 = vpop.f32.mrb[8].mxu1 }
  0xf7   :  { %v564_v44 = vadd.f32 %v560_v42, %v418_v41  ;;  %v3701_v45 = vpop.f32.mrb[9].mxu1 }
  0xf9   :  { %4514 = vtanh.f32 %v564_v44 }
  0xfc   :  { %v4513_v47 = vpop.eup %4512 }
  0xfd   :  { %v566_v48 = vsel %vm222_vm4, %v4513_v47, 0.0 }
  0xfe   :  { %3719 = vmatmul.mubr.msk.f32.vlgmr.msra.gmra.mrb[10].mxu0 %vm573_vm5, %v566_v48 }
  0xff   :  { %4240 = vmatpush3.bf16.msra.mxu0 %v4744_v10  ;;  %3748 = vmatprep.mubr.msk.f32.mxu0 %vm4589_vm3, %v4590_v32 }
 0x100   :  { %4241 = vmatprep.subr.bf16.mxu0 %v4588_v9 }
 0x103   :  { %v4515_v50 = vpop.eup %4514  ;;  %4243 = vmatpush3.bf16.msra.mxu0 %v4768_v17 }
 0x104   :  { %v648_v51 = vsel %vm222_vm4, %v4515_v50, 0.0  ;;  %4250 = vmatprep.subr.bf16.mxu0 %v4588_v9 }
 0x105   :  { %3738 = vmatmul.mubr.msk.f32.vlgmr.msra.gmra.mrb[10].mxu1 %vm573_vm5, %v648_v51 }
 0x106   :  { %4246 = vmatpush3.bf16.msra.mxu1 %v4788_v23  ;;  %3749 = vmatmul.mubr.msk.f32.vlgmr.msra.gmra.mrb[12].mxu0 %vm222_vm4, %v4513_v47 }
 0x107   :  { %4247 = vmatprep.subr.bf16.mxu1 %v4588_v9  ;;  %3759 = vmatprep.mubr.msk.f32.mxu1 %vm4589_vm3, %v4590_v32 }
 0x108   :  { %4252 = vmatpush3.bf16.msra.mxu0 %v4853_v37  ;;  %3778 = vmatprep.mubr.msk.f32.mxu0 %vm4589_vm3, %v4590_v32 }
 0x109   :  { %4253 = vmatprep.subr.bf16.mxu0 %v4588_v9 }
 0x10a   :  { %4249 = vmatpush3.bf16.msra.mxu1 %v4816_v30 }
 0x10b   :  { %4262 = vmatprep.subr.bf16.mxu1 %v4588_v9 }
 0x10c   :  { %4255 = vmatpush3.bf16.msra.mxu0 %v4863_v40 }
 0x10d   :  { %3760 = vmatmul.mubr.msk.f32.vlgmr.msra.gmra.mrb[12].mxu1 %vm222_vm4, %v4515_v50  ;;  %4256 = vmatprep.subr.bf16.mxu0 %v4588_v9 }
 0x10e   :  { %4264 = vmatpush3.bf16.msra.mxu1 %v4872_v43  ;;  %3797 = vmatprep.mubr.msk.f32.mxu1 %vm4589_vm3, %v4590_v32 }
 0x10f   :  { %4265 = vmatprep.subr.bf16.mxu1 %v4588_v9 }
 0x110   :  { %4258 = vmatpush3.bf16.msra.mxu0 %v4882_v46 }
 0x111   :  { %4259 = vmatprep.subr.bf16.mxu0 %v4588_v9 }
 0x112   :  { %4267 = vmatpush3.bf16.msra.mxu1 %v4892_v49 }
 0x113   :  { %4268 = vmatprep.subr.bf16.mxu1 %v4588_v9 }
 0x114   :  { %4261 = vmatpush3.bf16.msra.mxu0 %v4902_v52 }
 0x115   :  { %4274 = vmatprep.subr.bf16.mxu0 %v4588_v9 }
 0x116   :  { %4270 = vmatpush3.bf16.msra.mxu1 %v4911_v55 }
 0x117   :  { %4271 = vmatprep.subr.bf16.mxu1 %v4588_v9 }
 0x11a   :  { %4273 = vmatpush3.bf16.msra.mxu1 %v4923_v58 }
 0x11b   :  { %4280 = vmatprep.subr.bf16.mxu1 %v4588_v9 }
 0x1d1   :  { %v643_v54 = vpop.f32.mrb[10].mxu0 }
 0x1d2   :  { %v644_v56 = vadd.f32 %v4990_v53, %v643_v54  ;;  %v3720_v57 = vpop.f32.mrb[11].mxu0 }
 0x1d4   :  { %4516 = vtanh.f32 %v644_v56 }
 0x1d8   :  { %v724_v60 = vpop.f32.mrb[10].mxu1 }
 0x1d9   :  { %v725_v61 = vadd.f32 %v4996_v59, %v724_v60  ;;  %v800_v62 = vpop.f32.mrb[12].mxu0  ;;  %v3739_v63 = vpop.f32.mrb[11].mxu1 }
 0x1da   :  { %v3750_v0 = vpop.f32.mrb[13].mxu0  ;;  %v804_v6 = vadd.f32 %v800_v62, %v729_v5 }
 0x1db   :  { %4518 = vtanh.f32 %v725_v61 }
 0x1dc   :  { %4520 = vtanh.f32 %v804_v6 }
 0x1de   :  { %v4517_v1 = vpop.eup %4516 }
 0x1df   :  { %882 = vrot.lane.b32.xlu0 %v4517_v1, %s4591_s6  ;;  %v1349_v1 = vld [vmem:[#allocation2 + $0x18] sm:$0xff] }
 0x1e0   :  { %v875_v2 = vpop.f32.mrb[12].mxu1 }
 0x1e1   :  { %v3761_v3 = vpop.f32.mrb[13].mxu1  ;;  %v879_v8 = vadd.f32 %v875_v2, %v730_v7 }
 0x1e2   :  { %v1350_v3 = vld [vmem:[#allocation3 + $0x18] sm:$0xff] }
 0x1e3   :  { %4522 = vtanh.f32 %v879_v8 }
 0x1e5   :  { %v4519_v4 = vpop.eup %4518 }
 0x1e6   :  { %961 = vrot.lane.b32.xlu0 %v4519_v4, %s4591_s6  ;;  %v4521_v11 = vpop.eup %4520 }
 0x1ed   :  { %v4523_v14 = vpop.eup %4522 }
 0x251   :  { %v883_v12 = vpop.permute.xlu0 %882 }
 0x252   :  { %v885_v13 = vsel %vm222_vm4, %v4521_v11, %v883_v12 }
 0x253   :  { %3779 = vmatmul.mubr.msk.f32.vlgmr.msra.gmra.mrb[14].mxu0 %vm573_vm5, %v885_v13 }
 0x254   :  { %4276 = vmatpush3.bf16.msra.mxu0 %v4744_v10  ;;  %3808 = vmatprep.mubr.msk.f32.mxu0 %vm4589_vm3, %v4590_v32 }
 0x255   :  { %4277 = vmatprep.subr.bf16.mxu0 %v4588_v9 }
 0x258   :  { %v962_v15 = vpop.permute.xlu0 %961  ;;  %4279 = vmatpush3.bf16.msra.mxu0 %v4768_v17 }
 0x259   :  { %v964_v16 = vsel %vm222_vm4, %v4523_v14, %v962_v15  ;;  %4286 = vmatprep.subr.bf16.mxu0 %v4588_v9 }
 0x25a   :  { %3798 = vmatmul.mubr.msk.f32.vlgmr.msra.gmra.mrb[14].mxu1 %vm573_vm5, %v964_v16 }
 0x25b   :  { %4282 = vmatpush3.bf16.msra.mxu1 %v4788_v23  ;;  %3809 = vmatmul.mubr.msk.f32.vlgmr.msra.gmra.mrb[16].mxu0 %vm222_vm4, %v4521_v11 }
 0x25c   :  { %4283 = vmatprep.subr.bf16.mxu1 %v4588_v9  ;;  %3819 = vmatprep.mubr.msk.f32.mxu1 %vm4589_vm3, %v4590_v32 }
 0x25d   :  { %4288 = vmatpush3.bf16.msra.mxu0 %v4853_v37  ;;  %3838 = vmatprep.mubr.msk.f32.mxu0 %vm4589_vm3, %v4590_v32 }
 0x25e   :  { %4289 = vmatprep.subr.bf16.mxu0 %v4588_v9 }
 0x25f   :  { %4285 = vmatpush3.bf16.msra.mxu1 %v4816_v30 }
 0x260   :  { %4298 = vmatprep.subr.bf16.mxu1 %v4588_v9 }
 0x261   :  { %4291 = vmatpush3.bf16.msra.mxu0 %v4863_v40 }
 0x262   :  { %3820 = vmatmul.mubr.msk.f32.vlgmr.msra.gmra.mrb[16].mxu1 %vm222_vm4, %v4523_v14  ;;  %4292 = vmatprep.subr.bf16.mxu0 %v4588_v9 }
 0x263   :  { %4300 = vmatpush3.bf16.msra.mxu1 %v4872_v43  ;;  %3857 = vmatprep.mubr.msk.f32.mxu1 %vm4589_vm3, %v4590_v32 }
 0x264   :  { %4301 = vmatprep.subr.bf16.mxu1 %v4588_v9 }
 0x265   :  { %4294 = vmatpush3.bf16.msra.mxu0 %v4882_v46 }
 0x266   :  { %4295 = vmatprep.subr.bf16.mxu0 %v4588_v9 }
 0x267   :  { %4303 = vmatpush3.bf16.msra.mxu1 %v4892_v49 }
 0x268   :  { %4304 = vmatprep.subr.bf16.mxu1 %v4588_v9 }
 0x269   :  { %4297 = vmatpush3.bf16.msra.mxu0 %v4902_v52 }
 0x26a   :  { %4310 = vmatprep.subr.bf16.mxu0 %v4588_v9 }
 0x26b   :  { %4306 = vmatpush3.bf16.msra.mxu1 %v4911_v55 }
 0x26c   :  { %4307 = vmatprep.subr.bf16.mxu1 %v4588_v9 }
 0x26f   :  { %4309 = vmatpush3.bf16.msra.mxu1 %v4923_v58 }
 0x270   :  { %4316 = vmatprep.subr.bf16.mxu1 %v4588_v9 }
 0x326   :  { %v955_v18 = vpop.f32.mrb[14].mxu0 }
 0x327   :  { %v956_v19 = vadd.f32 %v4990_v53, %v955_v18  ;;  %v3780_v20 = vpop.f32.mrb[15].mxu0 }
 0x329   :  { %4524 = vtanh.f32 %v956_v19 }
 0x32d   :  { %v1034_v21 = vpop.f32.mrb[14].mxu1 }
 0x32e   :  { %v1035_v22 = vadd.f32 %v4996_v59, %v1034_v21  ;;  %v3799_v24 = vpop.f32.mrb[15].mxu1  ;;  %v1110_v25 = vpop.f32.mrb[16].mxu0 }
 0x32f   :  { %v3810_v26 = vpop.f32.mrb[17].mxu0  ;;  %v1114_v34 = vadd.f32 %v1110_v25, %v1039_v33 }
 0x330   :  { %4526 = vtanh.f32 %v1035_v22 }
 0x331   :  { %4528 = vtanh.f32 %v1114_v34 }
 0x333   :  { %v4525_v27 = vpop.eup %4524 }
 0x334   :  { %1192 = vrot.lane.b32.xlu1 %v4525_v27, %s4591_s6  ;;  %v1659_v27 = vld [vmem:[#allocation2 + $0x20] sm:$0xff] }
 0x335   :  { %v1185_v28 = vpop.f32.mrb[16].mxu1 }
 0x336   :  { %v3821_v29 = vpop.f32.mrb[17].mxu1  ;;  %v1189_v36 = vadd.f32 %v1185_v28, %v1040_v35 }
 0x337   :  { %v1660_v29 = vld [vmem:[#allocation3 + $0x20] sm:$0xff] }
 0x338   :  { %4530 = vtanh.f32 %v1189_v36 }
 0x33a   :  { %v4527_v31 = vpop.eup %4526 }
 0x33b   :  { %1271 = vrot.lane.b32.xlu1 %v4527_v31, %s4591_s6  ;;  %v4529_v38 = vpop.eup %4528 }
 0x342   :  { %v4531_v42 = vpop.eup %4530 }
 0x3a6   :  { %v1193_v39 = vpop.permute.xlu1 %1192 }
 0x3a7   :  { %v1195_v41 = vsel %vm222_vm4, %v4529_v38, %v1193_v39 }
 0x3a8   :  { %3839 = vmatmul.mubr.msk.f32.vlgmr.msra.gmra.mrb[18].mxu0 %vm573_vm5, %v1195_v41 }
 0x3a9   :  { %4312 = vmatpush3.bf16.msra.mxu0 %v4744_v10  ;;  %3868 = vmatprep.mubr.msk.f32.mxu0 %vm4589_vm3, %v4590_v32 }
 0x3aa   :  { %4313 = vmatprep.subr.bf16.mxu0 %v4588_v9 }
 0x3ad   :  { %v1272_v44 = vpop.permute.xlu1 %1271  ;;  %4315 = vmatpush3.bf16.msra.mxu0 %v4768_v17 }
 0x3ae   :  { %v1274_v45 = vsel %vm222_vm4, %v4531_v42, %v1272_v44  ;;  %4322 = vmatprep.subr.bf16.mxu0 %v4588_v9 }
 0x3af   :  { %3858 = vmatmul.mubr.msk.f32.vlgmr.msra.gmra.mrb[18].mxu1 %vm573_vm5, %v1274_v45 }
 0x3b0   :  { %4318 = vmatpush3.bf16.msra.mxu1 %v4788_v23  ;;  %3869 = vmatmul.mubr.msk.f32.vlgmr.msra.gmra.mrb[20].mxu0 %vm222_vm4, %v4529_v38 }
 0x3b1   :  { %4319 = vmatprep.subr.bf16.mxu1 %v4588_v9  ;;  %3879 = vmatprep.mubr.msk.f32.mxu1 %vm4589_vm3, %v4590_v32 }
 0x3b2   :  { %4324 = vmatpush3.bf16.msra.mxu0 %v4853_v37  ;;  %3898 = vmatprep.mubr.msk.f32.mxu0 %vm4589_vm3, %v4590_v32 }
 0x3b3   :  { %4325 = vmatprep.subr.bf16.mxu0 %v4588_v9 }
 0x3b4   :  { %4321 = vmatpush3.bf16.msra.mxu1 %v4816_v30 }
 0x3b5   :  { %4334 = vmatprep.subr.bf16.mxu1 %v4588_v9 }
 0x3b6   :  { %4327 = vmatpush3.bf16.msra.mxu0 %v4863_v40 }
 0x3b7   :  { %3880 = vmatmul.mubr.msk.f32.vlgmr.msra.gmra.mrb[20].mxu1 %vm222_vm4, %v4531_v42  ;;  %4328 = vmatprep.subr.bf16.mxu0 %v4588_v9 }
 0x3b8   :  { %4336 = vmatpush3.bf16.msra.mxu1 %v4872_v43  ;;  %3917 = vmatprep.mubr.msk.f32.mxu1 %vm4589_vm3, %v4590_v32 }
 0x3b9   :  { %4337 = vmatprep.subr.bf16.mxu1 %v4588_v9 }
 0x3ba   :  { %4330 = vmatpush3.bf16.msra.mxu0 %v4882_v46 }
 0x3bb   :  { %4331 = vmatprep.subr.bf16.mxu0 %v4588_v9 }
 0x3bc   :  { %4339 = vmatpush3.bf16.msra.mxu1 %v4892_v49 }
 0x3bd   :  { %4340 = vmatprep.subr.bf16.mxu1 %v4588_v9 }
 0x3be   :  { %4333 = vmatpush3.bf16.msra.mxu0 %v4902_v52 }
 0x3bf   :  { %4346 = vmatprep.subr.bf16.mxu0 %v4588_v9 }
 0x3c0   :  { %4342 = vmatpush3.bf16.msra.mxu1 %v4911_v55 }
 0x3c1   :  { %4343 = vmatprep.subr.bf16.mxu1 %v4588_v9 }
 0x3c4   :  { %4345 = vmatpush3.bf16.msra.mxu1 %v4923_v58 }
 0x3c5   :  { %4352 = vmatprep.subr.bf16.mxu1 %v4588_v9 }
 0x47b   :  { %v1265_v47 = vpop.f32.mrb[18].mxu0 }
 0x47c   :  { %v1266_v48 = vadd.f32 %v4990_v53, %v1265_v47  ;;  %v3840_v50 = vpop.f32.mrb[19].mxu0 }
 0x47e   :  { %4532 = vtanh.f32 %v1266_v48 }
 0x482   :  { %v1344_v51 = vpop.f32.mrb[18].mxu1 }
 0x483   :  { %v1345_v54 = vadd.f32 %v4996_v59, %v1344_v51  ;;  %v3859_v56 = vpop.f32.mrb[19].mxu1  ;;  %v1420_v57 = vpop.f32.mrb[20].mxu0 }
 0x484   :  { %v3870_v60 = vpop.f32.mrb[21].mxu0  ;;  %v1424_v2 = vadd.f32 %v1420_v57, %v1349_v1 }
 0x485   :  { %4534 = vtanh.f32 %v1345_v54 }
 0x486   :  { %4536 = vtanh.f32 %v1424_v2 }
 0x488   :  { %v4533_v61 = vpop.eup %4532 }
 0x489   :  { %1502 = vrot.lane.b32.xlu0 %v4533_v61, %s4591_s6  ;;  %v1969_v61 = vld [vmem:[#allocation2 + $0x28] sm:$0xff] }
 0x48a   :  { %v1495_v62 = vpop.f32.mrb[20].mxu1 }
 0x48b   :  { %v3881_v63 = vpop.f32.mrb[21].mxu1  ;;  %v1499_v4 = vadd.f32 %v1495_v62, %v1350_v3 }
 0x48c   :  { %v1970_v63 = vld [vmem:[#allocation3 + $0x28] sm:$0xff] }
 0x48d   :  { %4538 = vtanh.f32 %v1499_v4 }
 0x48f   :  { %v4535_v0 = vpop.eup %4534 }
 0x490   :  { %1581 = vrot.lane.b32.xlu1 %v4535_v0, %s4591_s6  ;;  %v4537_v5 = vpop.eup %4536 }
 0x497   :  { %v4539_v8 = vpop.eup %4538 }
 0x4fb   :  { %v1503_v6 = vpop.permute.xlu0 %1502 }
 0x4fc   :  { %v1505_v7 = vsel %vm222_vm4, %v4537_v5, %v1503_v6 }
 0x4fd   :  { %3899 = vmatmul.mubr.msk.f32.vlgmr.msra.gmra.mrb[22].mxu0 %vm573_vm5, %v1505_v7 }
 0x4fe   :  { %4348 = vmatpush3.bf16.msra.mxu0 %v4744_v10  ;;  %3928 = vmatprep.mubr.msk.f32.mxu0 %vm4589_vm3, %v4590_v32 }
 0x4ff   :  { %4349 = vmatprep.subr.bf16.mxu0 %v4588_v9 }
 0x502   :  { %v1582_v11 = vpop.permute.xlu1 %1581  ;;  %4351 = vmatpush3.bf16.msra.mxu0 %v4768_v17 }
 0x503   :  { %v1584_v12 = vsel %vm222_vm4, %v4539_v8, %v1582_v11  ;;  %4358 = vmatprep.subr.bf16.mxu0 %v4588_v9 }
 0x504   :  { %3918 = vmatmul.mubr.msk.f32.vlgmr.msra.gmra.mrb[22].mxu1 %vm573_vm5, %v1584_v12 }
 0x505   :  { %4354 = vmatpush3.bf16.msra.mxu1 %v4788_v23  ;;  %3929 = vmatmul.mubr.msk.f32.vlgmr.msra.gmra.mrb[24].mxu0 %vm222_vm4, %v4537_v5 }
 0x506   :  { %4355 = vmatprep.subr.bf16.mxu1 %v4588_v9  ;;  %3939 = vmatprep.mubr.msk.f32.mxu1 %vm4589_vm3, %v4590_v32 }
 0x507   :  { %4360 = vmatpush3.bf16.msra.mxu0 %v4853_v37  ;;  %3958 = vmatprep.mubr.msk.f32.mxu0 %vm4589_vm3, %v4590_v32 }
 0x508   :  { %4361 = vmatprep.subr.bf16.mxu0 %v4588_v9 }
 0x509   :  { %4357 = vmatpush3.bf16.msra.mxu1 %v4816_v30 }
 0x50a   :  { %4370 = vmatprep.subr.bf16.mxu1 %v4588_v9 }
 0x50b   :  { %4363 = vmatpush3.bf16.msra.mxu0 %v4863_v40 }
 0x50c   :  { %3940 = vmatmul.mubr.msk.f32.vlgmr.msra.gmra.mrb[24].mxu1 %vm222_vm4, %v4539_v8  ;;  %4364 = vmatprep.subr.bf16.mxu0 %v4588_v9 }
 0x50d   :  { %4372 = vmatpush3.bf16.msra.mxu1 %v4872_v43  ;;  %3977 = vmatprep.mubr.msk.f32.mxu1 %vm4589_vm3, %v4590_v32 }
 0x50e   :  { %4373 = vmatprep.subr.bf16.mxu1 %v4588_v9 }
 0x50f   :  { %4366 = vmatpush3.bf16.msra.mxu0 %v4882_v46 }
 0x510   :  { %4367 = vmatprep.subr.bf16.mxu0 %v4588_v9 }
 0x511   :  { %4375 = vmatpush3.bf16.msra.mxu1 %v4892_v49 }
 0x512   :  { %4376 = vmatprep.subr.bf16.mxu1 %v4588_v9 }
 0x513   :  { %4369 = vmatpush3.bf16.msra.mxu0 %v4902_v52 }
 0x514   :  { %4382 = vmatprep.subr.bf16.mxu0 %v4588_v9 }
 0x515   :  { %4378 = vmatpush3.bf16.msra.mxu1 %v4911_v55 }
 0x516   :  { %4379 = vmatprep.subr.bf16.mxu1 %v4588_v9 }
 0x519   :  { %4381 = vmatpush3.bf16.msra.mxu1 %v4923_v58 }
 0x51a   :  { %4388 = vmatprep.subr.bf16.mxu1 %v4588_v9 }
 0x5d0   :  { %v1575_v13 = vpop.f32.mrb[22].mxu0 }
 0x5d1   :  { %v1576_v14 = vadd.f32 %v4990_v53, %v1575_v13  ;;  %v3900_v15 = vpop.f32.mrb[23].mxu0 }
 0x5d3   :  { %4540 = vtanh.f32 %v1576_v14 }
 0x5d7   :  { %v1654_v16 = vpop.f32.mrb[22].mxu1 }
 0x5d8   :  { %v1655_v18 = vadd.f32 %v4996_v59, %v1654_v16  ;;  %v3919_v19 = vpop.f32.mrb[23].mxu1  ;;  %v1730_v20 = vpop.f32.mrb[24].mxu0 }
 0x5d9   :  { %v3930_v21 = vpop.f32.mrb[25].mxu0  ;;  %v1734_v28 = vadd.f32 %v1730_v20, %v1659_v27 }
 0x5da   :  { %4542 = vtanh.f32 %v1655_v18 }
 0x5db   :  { %4544 = vtanh.f32 %v1734_v28 }
 0x5dd   :  { %v4541_v22 = vpop.eup %4540 }
 0x5de   :  { %1812 = vrot.lane.b32.xlu0 %v4541_v22, %s4591_s6  ;;  %v2279_v22 = vld [vmem:[#allocation2 + $0x30] sm:$0xff] }
 0x5df   :  { %v1805_v24 = vpop.f32.mrb[24].mxu1 }
 0x5e0   :  { %v3941_v25 = vpop.f32.mrb[25].mxu1  ;;  %v1809_v31 = vadd.f32 %v1805_v24, %v1660_v29 }
 0x5e1   :  { %v2280_v25 = vld [vmem:[#allocation3 + $0x30] sm:$0xff] }
 0x5e2   :  { %4546 = vtanh.f32 %v1809_v31 }
 0x5e4   :  { %v4543_v26 = vpop.eup %4542 }
 0x5e5   :  { %1891 = vrot.lane.b32.xlu1 %v4543_v26, %s4591_s6  ;;  %v4545_v33 = vpop.eup %4544 }
 0x5ec   :  { %v4547_v36 = vpop.eup %4546 }
 0x650   :  { %v1813_v34 = vpop.permute.xlu0 %1812 }
 0x651   :  { %v1815_v35 = vsel %vm222_vm4, %v4545_v33, %v1813_v34 }
 0x652   :  { %3959 = vmatmul.mubr.msk.f32.vlgmr.msra.gmra.mrb[26].mxu0 %vm573_vm5, %v1815_v35  ;;  %v2589_v35 = vld [vmem:[#allocation2 + $0x38] sm:$0xff] }
 0x653   :  { %4384 = vmatpush3.bf16.msra.mxu0 %v4744_v10  ;;  %3988 = vmatprep.mubr.msk.f32.mxu0 %vm4589_vm3, %v4590_v32 }
 0x654   :  { %4385 = vmatprep.subr.bf16.mxu0 %v4588_v9 }
 0x657   :  { %v1892_v38 = vpop.permute.xlu1 %1891  ;;  %4387 = vmatpush3.bf16.msra.mxu0 %v4768_v17 }
 0x658   :  { %v1894_v39 = vsel %vm222_vm4, %v4547_v36, %v1892_v38  ;;  %4394 = vmatprep.subr.bf16.mxu0 %v4588_v9  ;;  %v2590_v38 = vld [vmem:[#allocation3 + $0x38] sm:$0xff] }
 0x659   :  { %3978 = vmatmul.mubr.msk.f32.vlgmr.msra.gmra.mrb[26].mxu1 %vm573_vm5, %v1894_v39 }
 0x65a   :  { %4390 = vmatpush3.bf16.msra.mxu1 %v4788_v23  ;;  %3989 = vmatmul.mubr.msk.f32.vlgmr.msra.gmra.mrb[28].mxu0 %vm222_vm4, %v4545_v33 }
 0x65b   :  { %4391 = vmatprep.subr.bf16.mxu1 %v4588_v9  ;;  %3999 = vmatprep.mubr.msk.f32.mxu1 %vm4589_vm3, %v4590_v32 }
 0x65c   :  { %4396 = vmatpush3.bf16.msra.mxu0 %v4853_v37  ;;  %4018 = vmatprep.mubr.msk.f32.mxu0 %vm4589_vm3, %v4590_v32 }
 0x65d   :  { %4397 = vmatprep.subr.bf16.mxu0 %v4588_v9 }
 0x65e   :  { %4393 = vmatpush3.bf16.msra.mxu1 %v4816_v30 }
 0x65f   :  { %4406 = vmatprep.subr.bf16.mxu1 %v4588_v9 }
 0x660   :  { %4399 = vmatpush3.bf16.msra.mxu0 %v4863_v40 }
 0x661   :  { %4000 = vmatmul.mubr.msk.f32.vlgmr.msra.gmra.mrb[28].mxu1 %vm222_vm4, %v4547_v36  ;;  %4400 = vmatprep.subr.bf16.mxu0 %v4588_v9 }
 0x662   :  { %4408 = vmatpush3.bf16.msra.mxu1 %v4872_v43  ;;  %4037 = vmatprep.mubr.msk.f32.mxu1 %vm4589_vm3, %v4590_v32 }
 0x663   :  { %4409 = vmatprep.subr.bf16.mxu1 %v4588_v9 }
 0x664   :  { %4402 = vmatpush3.bf16.msra.mxu0 %v4882_v46 }
 0x665   :  { %4403 = vmatprep.subr.bf16.mxu0 %v4588_v9 }
 0x666   :  { %4411 = vmatpush3.bf16.msra.mxu1 %v4892_v49 }
 0x667   :  { %4412 = vmatprep.subr.bf16.mxu1 %v4588_v9 }
 0x668   :  { %4405 = vmatpush3.bf16.msra.mxu0 %v4902_v52 }
 0x669   :  { %4418 = vmatprep.subr.bf16.mxu0 %v4588_v9 }
 0x66a   :  { %4414 = vmatpush3.bf16.msra.mxu1 %v4911_v55 }
 0x66b   :  { %4415 = vmatprep.subr.bf16.mxu1 %v4588_v9 }
 0x66e   :  { %4417 = vmatpush3.bf16.msra.mxu1 %v4923_v58 }
 0x66f   :  { %4424 = vmatprep.subr.bf16.mxu1 %v4588_v9 }
 0x725   :  { %v1885_v41 = vpop.f32.mrb[26].mxu0 }
 0x726   :  { %v1886_v42 = vadd.f32 %v4990_v53, %v1885_v41  ;;  %v3960_v44 = vpop.f32.mrb[27].mxu0 }
 0x728   :  { %4548 = vtanh.f32 %v1886_v42 }
 0x72c   :  { %v1964_v45 = vpop.f32.mrb[26].mxu1 }
 0x72d   :  { %v1965_v47 = vadd.f32 %v4996_v59, %v1964_v45  ;;  %v3979_v48 = vpop.f32.mrb[27].mxu1  ;;  %v2040_v50 = vpop.f32.mrb[28].mxu0 }
 0x72e   :  { %v3990_v51 = vpop.f32.mrb[29].mxu0  ;;  %v2044_v62 = vadd.f32 %v2040_v50, %v1969_v61 }
 0x72f   :  { %4550 = vtanh.f32 %v1965_v47 }
 0x730   :  { %4552 = vtanh.f32 %v2044_v62 }
 0x732   :  { %v4549_v54 = vpop.eup %4548 }
 0x733   :  { %2122 = vrot.lane.b32.xlu0 %v4549_v54, %s4591_s6 }
 0x734   :  { %v2115_v56 = vpop.f32.mrb[28].mxu1 }
 0x735   :  { %v4001_v57 = vpop.f32.mrb[29].mxu1  ;;  %v2119_v0 = vadd.f32 %v2115_v56, %v1970_v63 }
 0x737   :  { %4554 = vtanh.f32 %v2119_v0 }
 0x739   :  { %v4551_v60 = vpop.eup %4550 }
 0x73a   :  { %2201 = vrot.lane.b32.xlu1 %v4551_v60, %s4591_s6  ;;  %v4553_v1 = vpop.eup %4552 }
 0x741   :  { %v4555_v4 = vpop.eup %4554 }
 0x7a5   :  { %v2123_v2 = vpop.permute.xlu0 %2122 }
 0x7a6   :  { %v2125_v3 = vsel %vm222_vm4, %v4553_v1, %v2123_v2 }
 0x7a7   :  { %4019 = vmatmul.mubr.msk.f32.vlgmr.msra.gmra.mrb[30].mxu0 %vm573_vm5, %v2125_v3 }
 0x7a8   :  { %4420 = vmatpush3.bf16.msra.mxu0 %v4744_v10  ;;  %4048 = vmatprep.mubr.msk.f32.mxu0 %vm4589_vm3, %v4590_v32 }
 0x7a9   :  { %4421 = vmatprep.subr.bf16.mxu0 %v4588_v9 }
 0x7ac   :  { %v2202_v5 = vpop.permute.xlu1 %2201  ;;  %4423 = vmatpush3.bf16.msra.mxu0 %v4768_v17 }
 0x7ad   :  { %v2204_v6 = vsel %vm222_vm4, %v4555_v4, %v2202_v5  ;;  %4430 = vmatprep.subr.bf16.mxu0 %v4588_v9 }
 0x7ae   :  { %4038 = vmatmul.mubr.msk.f32.vlgmr.msra.gmra.mrb[30].mxu1 %vm573_vm5, %v2204_v6 }
 0x7af   :  { %4426 = vmatpush3.bf16.msra.mxu1 %v4788_v23  ;;  %4049 = vmatmul.mubr.msk.f32.vlgmr.msra.gmra.mrb[32].mxu0 %vm222_vm4, %v4553_v1 }
 0x7b0   :  { %4427 = vmatprep.subr.bf16.mxu1 %v4588_v9  ;;  %4059 = vmatprep.mubr.msk.f32.mxu1 %vm4589_vm3, %v4590_v32 }
 0x7b1   :  { %4432 = vmatpush3.bf16.msra.mxu0 %v4853_v37  ;;  %4078 = vmatprep.mubr.msk.f32.mxu0 %vm4589_vm3, %v4590_v32 }
 0x7b2   :  { %4433 = vmatprep.subr.bf16.mxu0 %v4588_v9 }
 0x7b3   :  { %4429 = vmatpush3.bf16.msra.mxu1 %v4816_v30 }
 0x7b4   :  { %4442 = vmatprep.subr.bf16.mxu1 %v4588_v9 }
 0x7b5   :  { %4435 = vmatpush3.bf16.msra.mxu0 %v4863_v40 }
 0x7b6   :  { %4060 = vmatmul.mubr.msk.f32.vlgmr.msra.gmra.mrb[32].mxu1 %vm222_vm4, %v4555_v4  ;;  %4436 = vmatprep.subr.bf16.mxu0 %v4588_v9 }
 0x7b7   :  { %4444 = vmatpush3.bf16.msra.mxu1 %v4872_v43  ;;  %4097 = vmatprep.mubr.msk.f32.mxu1 %vm4589_vm3, %v4590_v32 }
 0x7b8   :  { %4445 = vmatprep.subr.bf16.mxu1 %v4588_v9 }
 0x7b9   :  { %4438 = vmatpush3.bf16.msra.mxu0 %v4882_v46 }
 0x7ba   :  { %4439 = vmatprep.subr.bf16.mxu0 %v4588_v9 }
 0x7bb   :  { %4447 = vmatpush3.bf16.msra.mxu1 %v4892_v49 }
 0x7bc   :  { %4448 = vmatprep.subr.bf16.mxu1 %v4588_v9 }
 0x7bd   :  { %4441 = vmatpush3.bf16.msra.mxu0 %v4902_v52 }
 0x7be   :  { %4454 = vmatprep.subr.bf16.mxu0 %v4588_v9 }
 0x7bf   :  { %4450 = vmatpush3.bf16.msra.mxu1 %v4911_v55 }
 0x7c0   :  { %4451 = vmatprep.subr.bf16.mxu1 %v4588_v9 }
 0x7c3   :  { %4453 = vmatpush3.bf16.msra.mxu1 %v4923_v58 }
 0x7c4   :  { %4460 = vmatprep.subr.bf16.mxu1 %v4588_v9 }
 0x87a   :  { %v2195_v7 = vpop.f32.mrb[30].mxu0 }
 0x87b   :  { %v2196_v8 = vadd.f32 %v4990_v53, %v2195_v7  ;;  %v4020_v11 = vpop.f32.mrb[31].mxu0 }
 0x87c   :  { %v2929_v11 = vld [vmem:[%s5364_s9] sm:$0xff] }
 0x87d   :  { %4556 = vtanh.f32 %v2196_v8 }
 0x881   :  { %v2274_v12 = vpop.f32.mrb[30].mxu1 }
 0x882   :  { %v2275_v13 = vadd.f32 %v4996_v59, %v2274_v12  ;;  %v4039_v14 = vpop.f32.mrb[31].mxu1  ;;  %v2350_v15 = vpop.f32.mrb[32].mxu0  ;;  %v2930_v12 = vld [vmem:[%s5364_s9 + $0x8] sm:$0xff] }
 0x883   :  { %v4050_v16 = vpop.f32.mrb[33].mxu0  ;;  %v2354_v24 = vadd.f32 %v2350_v15, %v2279_v22  ;;  %v2931_v14 = vld [vmem:[%s5364_s9 + $0x10] sm:$0xff]  ;;  %v2932_v15 = vld [vmem:[%s5364_s9 + $0x18] sm:$0xff] }
 0x884   :  { %4558 = vtanh.f32 %v2275_v13  ;;  %v4491_v13 = vpack.c.bf16 %v2930_v12, %v2929_v11  ;;  %v4494_v16 = vpack.c.bf16 %v2932_v15, %v2931_v14 }
 0x885   :  { %4560 = vtanh.f32 %v2354_v24 }
 0x887   :  { %v4557_v18 = vpop.eup %4556 }
 0x888   :  { %2432 = vrot.lane.b32.xlu0 %v4557_v18, %s4591_s6 }
 0x889   :  { %v2425_v19 = vpop.f32.mrb[32].mxu1 }
 0x88a   :  { %v4061_v20 = vpop.f32.mrb[33].mxu1  ;;  %v2429_v26 = vadd.f32 %v2425_v19, %v2280_v25 }
 0x88c   :  { %4562 = vtanh.f32 %v2429_v26  ;;  %v3375_v26 = vld [vmem:[%s5365_s7] ss:$0 sm:$0xff] }
 0x88e   :  { %v4559_v21 = vpop.eup %4558 }
 0x88f   :  { %2511 = vrot.lane.b32.xlu1 %v4559_v21, %s4591_s6  ;;  %v4561_v27 = vpop.eup %4560 }
 0x896   :  { %v4563_v31 = vpop.eup %4562 }
 0x8fa   :  { %v2433_v28 = vpop.permute.xlu0 %2432 }
 0x8fb   :  { %v2435_v29 = vsel %vm222_vm4, %v4561_v27, %v2433_v28  ;;  %v3054_v28 = vld [vmem:[%s5366_s18] sm:$0xff] }
 0x8fc   :  { %4079 = vmatmul.mubr.msk.f32.vlgmr.msra.gmra.mrb[34].mxu0 %vm573_vm5, %v2435_v29  ;;  %v3055_v29 = vld [vmem:[%s5366_s18 + $0x8] sm:$0xff] }
 0x8fd   :  { %4456 = vmatpush3.bf16.msra.mxu0 %v4744_v10  ;;  %4108 = vmatprep.mubr.msk.f32.mxu0 %vm4589_vm3, %v4590_v32 }
 0x8fe   :  { %4457 = vmatprep.subr.bf16.mxu0 %v4588_v9 }
 0x901   :  { %v2512_v33 = vpop.permute.xlu1 %2511  ;;  %4459 = vmatpush3.bf16.msra.mxu0 %v4768_v17 }
 0x902   :  { %v2514_v34 = vsel %vm222_vm4, %v4563_v31, %v2512_v33  ;;  %4466 = vmatprep.subr.bf16.mxu0 %v4588_v9 }
 0x903   :  { %4098 = vmatmul.mubr.msk.f32.vlgmr.msra.gmra.mrb[34].mxu1 %vm573_vm5, %v2514_v34  ;;  %v4497_v34 = vpack.c.bf16 %v3055_v29, %v3054_v28 }
 0x904   :  { %4462 = vmatpush3.bf16.msra.mxu1 %v4788_v23  ;;  %4109 = vmatmul.mubr.msk.f32.vlgmr.msra.gmra.mrb[36].mxu0 %vm222_vm4, %v4561_v27 }
 0x905   :  { %4463 = vmatprep.subr.bf16.mxu1 %v4588_v9  ;;  %4119 = vmatprep.mubr.msk.f32.mxu1 %vm4589_vm3, %v4590_v32 }
 0x906   :  { %4468 = vmatpush3.bf16.msra.mxu0 %v4853_v37  ;;  %4138 = vmatprep.mubr.msk.f32.mxu0 %vm4589_vm3, %v4590_v32 }
 0x907   :  { %4469 = vmatprep.subr.bf16.mxu0 %v4588_v9 }
 0x908   :  { %4465 = vmatpush3.bf16.msra.mxu1 %v4816_v30 }
 0x909   :  { %4478 = vmatprep.subr.bf16.mxu1 %v4588_v9 }
 0x90a   :  { %4471 = vmatpush3.bf16.msra.mxu0 %v4863_v40 }
 0x90b   :  { %4120 = vmatmul.mubr.msk.f32.vlgmr.msra.gmra.mrb[36].mxu1 %vm222_vm4, %v4563_v31  ;;  %4472 = vmatprep.subr.bf16.mxu0 %v4588_v9  ;;  %v3376_v31 = vld [vmem:[%s5367_s8] ss:$0 sm:$0xff] }
 0x90c   :  { %4480 = vmatpush3.bf16.msra.mxu1 %v4872_v43  ;;  %4157 = vmatprep.mubr.msk.f32.mxu1 %vm4589_vm3, %v4590_v32 }
 0x90d   :  { %4481 = vmatprep.subr.bf16.mxu1 %v4588_v9 }
 0x90e   :  { %4474 = vmatpush3.bf16.msra.mxu0 %v4882_v46 }
 0x90f   :  { %4475 = vmatprep.subr.bf16.mxu0 %v4588_v9 }
 0x910   :  { %4483 = vmatpush3.bf16.msra.mxu1 %v4892_v49 }
 0x911   :  { %4484 = vmatprep.subr.bf16.mxu1 %v4588_v9 }
 0x912   :  { %4477 = vmatpush3.bf16.msra.mxu0 %v4902_v52 }
 0x913   :  { %4490 = vmatprep.subr.bf16.mxu0 %v4588_v9 }
 0x914   :  { %4486 = vmatpush3.bf16.msra.mxu1 %v4911_v55 }
 0x915   :  { %4487 = vmatprep.subr.bf16.mxu1 %v4588_v9 }
 0x918   :  { %4489 = vmatpush3.bf16.msra.mxu1 %v4923_v58 }
 0x919   :  { %4171 = vmatprep.subr.mxu1 %v4590_v32 }
 0x9cf   :  { %v2505_v10 = vpop.f32.mrb[34].mxu0 }
 0x9d0   :  { %v2506_v17 = vadd.f32 %v4990_v53, %v2505_v10  ;;  %v4080_v23 = vpop.f32.mrb[35].mxu0 }
 0x9d1   :  { %v3057_v23 = vld [vmem:[%s5366_s18 + $0x18] sm:$0xff] }
 0x9d2   :  { %4564 = vtanh.f32 %v2506_v17  ;;  %v3056_v17 = vld [vmem:[%s5366_s18 + $0x10] sm:$0xff] }
 0x9d6   :  { %v2584_v30 = vpop.f32.mrb[34].mxu1 }
 0x9d7   :  { %v2585_v37 = vadd.f32 %v4996_v59, %v2584_v30  ;;  %v4099_v40 = vpop.f32.mrb[35].mxu1  ;;  %v2660_v43 = vpop.f32.mrb[36].mxu0 }
 0x9d8   :  { %v4110_v46 = vpop.f32.mrb[37].mxu0  ;;  %v2664_v36 = vadd.f32 %v2660_v43, %v2589_v35  ;;  %v4500_v43 = vpack.c.bf16 %v3057_v23, %v3056_v17 }
 0x9d9   :  { %4566 = vtanh.f32 %v2585_v37  ;;  %v3379_v37 = vld [vmem:[%s5368_s16] ss:$0 sm:$0xff] }
 0x9da   :  { %4568 = vtanh.f32 %v2664_v36  ;;  %v3380_v46 = vld [vmem:[%s5369_s17] ss:$0 sm:$0xff] }
 0x9dc   :  { %v4565_v49 = vpop.eup %4564 }
 0x9dd   :  { %2742 = vrot.lane.b32.xlu0 %v4565_v49, %s4591_s6 }
 0x9de   :  { %v2735_v52 = vpop.f32.mrb[36].mxu1 }
 0x9df   :  { %v4121_v55 = vpop.f32.mrb[37].mxu1  ;;  %v2739_v39 = vadd.f32 %v2735_v52, %v2590_v38 }
 0x9e0   :  { %v3058_v55 = vld [vmem:[%s5370_s19] sm:$0x3f] }
 0x9e1   :  { %4570 = vtanh.f32 %v2739_v39 }
 0x9e3   :  { %v4567_v58 = vpop.eup %4566 }
 0x9e4   :  { %2821 = vrot.lane.b32.xlu1 %v4567_v58, %s4591_s6  ;;  %v4569_v41 = vpop.eup %4568  ;;  %v3377_v58 = vld [vmem:[%s5371_s10] ss:$0 sm:$0xff] }
 0x9eb   :  { %v4571_v45 = vpop.eup %4570 }
 0xa4f   :  { %v2743_v42 = vpop.permute.xlu0 %2742 }
 0xa50   :  { %v2745_v44 = vsel %vm222_vm4, %v4569_v41, %v2743_v42 }
 0xa51   :  { %4139 = vmatmul.mubr.msk.f32.vlgmr.msra.gmra.mrb[38].mxu0 %vm573_vm5, %v2745_v44  ;;  %v3218_v44 = vld [vmem:[%s5372_s21] sm:$0xff] }
 0xa52   :  { %4168 = vmatprep.mubr.msk.f32.mxu0 %vm4589_vm3, %v4590_v32  ;;  %4492 = vmatpush3.bf16.msra.mxu0 %v4491_v13 }
 0xa53   :  { %4493 = vmatprep.subr.bf16.mxu0 %v4588_v9 }
 0xa56   :  { %v2822_v47 = vpop.permute.xlu1 %2821  ;;  %4495 = vmatpush3.bf16.msra.mxu0 %v4494_v16 }
 0xa57   :  { %v2824_v48 = vsel %vm222_vm4, %v4571_v45, %v2822_v47  ;;  %4496 = vmatprep.subr.bf16.mxu0 %v4588_v9  ;;  %v3219_v45 = vld [vmem:[%s5372_s21 + $0x8] sm:$0xff] }
 0xa58   :  { %4158 = vmatmul.mubr.msk.f32.vlgmr.msra.gmra.mrb[38].mxu1 %vm573_vm5, %v2824_v48  ;;  %v4503_v47 = vpack.c.bf16 %v3219_v45, %v3218_v44  ;;  %v3220_v48 = vld [vmem:[%s5372_s21 + $0x10] sm:$0xff] }
 0xa59   :  { %4173 = vmatprep.mubr.msk.f32.mxu1 %vm4589_vm3, %v4590_v32  ;;  %4172 = vmatpush3.msk.msra.mxu1 %vm3062_vm6, %v3058_v55 }
 0xa5a   :  { %4502 = vmatprep.subr.bf16.mxu1 %v4588_v9 }
 0xb24   :  { %v2815_v50 = vpop.f32.mrb[38].mxu0 }
 0xb25   :  { %v2816_v51 = vadd.f32 %v4990_v53, %v2815_v50  ;;  %v4140_v54 = vpop.f32.mrb[39].mxu0 }
 0xb27   :  { %4572 = vtanh.f32 %v2816_v51 }
 0xb2b   :  { %v2894_v56 = vpop.f32.mrb[38].mxu1 }
 0xb2c   :  { %v2895_v57 = vadd.f32 %v4996_v59, %v2894_v56  ;;  %v4159_v60 = vpop.f32.mrb[39].mxu1 }
 0xb2e   :  { %4574 = vtanh.f32 %v2895_v57 }
 0xb31   :  { %v4573_v61 = vpop.eup %4572 }
 0xb32   :  { %v2901_v62 = vsel %vm222_vm4, %v4573_v61, 0.0 }
 0xb33   :  { %2902 = vadd.xlane.f32.xlu0 %v2901_v62 }
 0xb38   :  { %v4575_v63 = vpop.eup %4574 }
 0xb39   :  { %v3027_v0 = vsel %vm222_vm4, %v4575_v63, 0.0 }
 0xb3a   :  { %3028 = vadd.xlane.f32.xlu0 %v3027_v0 }
 0xbc0   :  { %v2903_v1 = vpop.xlane.xlu0 %2902 }
 0xbc1   :  { %v2905_v2 = vmul.f32 0.03125, %v2903_v1 }
 0xbc3   :  { %v2906_v3 = vsub.f32 %v4573_v61, %v2905_v2 }
 0xbc5   :  { %v2907_v4 = vmul.f32 %v2906_v3, %v2906_v3 }
 0xbc7   :  { %v3029_v53 = vpop.xlane.xlu0 %3028  ;;  %v2908_v5 = vsel %vm222_vm4, %v2907_v4, 0.0 }
 0xbc8   :  { %v3030_v6 = vmul.f32 0.03125, %v3029_v53  ;;  %2909 = vadd.xlane.f32.xlu1 %v2908_v5  ;;  %v3385_v53 = vld [vmem:[%s5375_s22] ss:$0 sm:$0xff] }
 0xbca   :  { %v3031_v59 = vsub.f32 %v4575_v63, %v3030_v6 }
 0xbcc   :  { %v3032_v7 = vmul.f32 %v3031_v59, %v3031_v59 }
 0xbce   :  { %v3033_v8 = vsel %vm222_vm4, %v3032_v7, 0.0 }
 0xbcf   :  { %3034 = vadd.xlane.f32.xlu0 %v3033_v8 }
 0xc55   :  { %v2910_v18 = vpop.xlane.xlu1 %2909 }
 0xc56   :  { %v2911_v19 = vmul.f32 0.03125, %v2910_v18 }
 0xc58   :  { %v2912_v20 = vadd.f32 1e-05, %v2911_v19 }
 0xc5a   :  { %4576 = vrsqrt.f32 %v2912_v20 }
 0xc5c   :  { %v3035_v21 = vpop.xlane.xlu0 %3034 }
 0xc5d   :  { %v3036_v22 = vmul.f32 0.03125, %v3035_v21 }
 0xc5f   :  { %v3037_v24 = vadd.f32 1e-05, %v3036_v22 }
 0xc61   :  { %4578 = vrsqrt.f32 %v3037_v24 }
 0xc64   :  { %v4577_v25 = vpop.eup %4576 }
 0xc65   :  { %v2914_v27 = vmul.f32 %v4577_v25, %v2906_v3 }
 0xc67   :  { %v2921_v33 = vmul.f32 %v3375_v26, %v2914_v27 }
 0xc69   :  { %v2928_v10 = vadd.f32 %v3376_v31, %v2921_v33 }
 0xc6b   :  { %v4579_v30 = vpop.eup %4578  ;;  %4169 = vmatmul.mubr.msk.f32.vlgmr.msra.gmra.mrb[40].mxu0 %vm222_vm4, %v2928_v10 }
 0xc6c   :  { %v3039_v40 = vmul.f32 %v4579_v30, %v3031_v59  ;;  %4498 = vmatpush3.bf16.msra.mxu0 %v4497_v34  ;;  %4184 = vmatprep.mubr.msk.f32.mxu0 %vm4589_vm3, %v4590_v32 }
 0xc6d   :  { %4499 = vmatprep.subr.bf16.mxu0 %v4588_v9 }
 0xc6e   :  { %v3046_v49 = vmul.f32 %v3379_v37, %v3039_v40 }
 0xc70   :  { %4501 = vmatpush3.bf16.msra.mxu0 %v4500_v43  ;;  %v3053_v52 = vadd.f32 %v3380_v46, %v3046_v49 }
 0xc73   :  { %4185 = vmatmul.mubr.msk.f32.vlgmr.msra.gmra.mrb[42].mxu0 %vm222_vm4, %v3053_v52 }
 0xd3e   :  { %v3009_v35 = vpop.f32.mrb[40].mxu0 }
 0xd3f   :  { %v3010_v36 = vadd.f32 %v3377_v58, %v3009_v35  ;;  %v4170_v38 = vpop.f32.mrb[41].mxu0 }
 0xd41   :  { %4174 = vmatmul.mubr.msk.f32.vlgmr.msra.gmra.mrb[40].mxu1 %vm3013_vm7, %v3010_v36  ;;  %v3014_v39 = vsel %vm3013_vm7, %v3010_v36, -inf }
 0xd42   :  { %3015 = vmax.xlane.f32.xlu1 %v3014_v39  ;;  %4195 = vmatprep.mubr.msk.f32.mxu1 %vm4589_vm3, %v4590_v32  ;;  %v3221_v32 = vld [vmem:[%s5372_s21 + $0x18] sm:$0xff] }
 0xd43   :  { %4504 = vmatpush3.bf16.msra.mxu1 %v4503_v47  ;;  %v4506_v50 = vpack.c.bf16 %v3221_v32, %v3220_v48 }
 0xd44   :  { %4505 = vmatprep.subr.bf16.mxu1 %v4588_v9  ;;  %v3384_v9 = vld [vmem:[%s5373_s20] ss:$0 sm:$0xff] }
 0xd46   :  { %v3205_v41 = vpop.f32.mrb[42].mxu0 }
 0xd47   :  { %v4186_v42 = vpop.f32.mrb[43].mxu0  ;;  %4507 = vmatpush3.bf16.msra.mxu1 %v4506_v50 }
 0xdcf   :  { %v3016_v51 = vpop.xlane.xlu1 %3015 }
 0xdd0   :  { %v3017_v54 = vsub.f32 %v3010_v36, %v3016_v51 }
 0xdd2   :  { %v3018_v56 = vmul.f32 1.442695, %v3017_v54 }
 0xdd4   :  { %4580 = vpow2.f32 %v3018_v56 }
 0xdde   :  { %v4581_v57 = vpop.eup %4580 }
 0xddf   :  { %v3020_v60 = vsel %vm3013_vm7, %v4581_v57, 0.0 }
 0xde0   :  { %3021 = vadd.xlane.f32.xlu1 %v3020_v60 }
 0xe14   :  { %v3132_v61 = vpop.f32.mrb[40].mxu1 }
 0xe15   :  { %v3206_v62 = vadd.f32 %v3205_v41, %v3132_v61  ;;  %v4175_v63 = vpop.f32.mrb[41].mxu1 }
 0xe17   :  { %v3216_v0 = vadd.f32 %v3384_v9, %v3206_v62 }
 0xe19   :  { %v3217_v1 = vmax.f32 %v3216_v0, 0.0 }
 0xe1b   :  { %4196 = vmatmul.mubr.msk.f32.vlgmr.msra.gmra.mrb[42].mxu1 %vm222_vm4, %v3217_v1 }
 0xe6d   :  { %v3022_v2 = vpop.xlane.xlu1 %3021 }
 0xe6e   :  { %4582 = vrcp.f32 %v3022_v2 }
 0xe78   :  { %v4583_v3 = vpop.eup %4582 }
 0xe79   :  { %v3024_v4 = vmul.f32 %v4583_v3, %v4581_v57 }
 0xe7b   :  { %3313 = vst.msk [vmem:[%s5374_s23] sm:$0xff] %vm3013_vm7, %v3024_v4 }
 0xeee   :  { %v3298_v5 = vpop.f32.mrb[42].mxu1 }
 0xeef   :  { %v3299_v6 = vadd.f32 %v3385_v53, %v3298_v5  ;;  %v4197_v59 = vpop.f32.mrb[43].mxu1 }
 0xef1   :  { %v3302_v7 = vsel %vm3013_vm7, %v3299_v6, -inf }
 0xef2   :  { %3303 = vmax.xlane.f32.xlu0 %v3302_v7 }
 0xf7f   :  { %v3304_v8 = vpop.xlane.xlu0 %3303 }
 0xf80   :  { %v3305_v11 = vsub.f32 %v3299_v6, %v3304_v8 }
 0xf82   :  { %v3306_v12 = vmul.f32 1.442695, %v3305_v11 }
 0xf84   :  { %4584 = vpow2.f32 %v3306_v12 }
 0xf8e   :  { %v4585_v13 = vpop.eup %4584 }
 0xf8f   :  { %v3308_v14 = vsel %vm3013_vm7, %v4585_v13, 0.0 }
 0xf90   :  { %3309 = vadd.xlane.f32.xlu0 %v3308_v14 }
0x101d   :  { %v3310_v15 = vpop.xlane.xlu0 %3309 }
0x101e   :  { %4586 = vrcp.f32 %v3310_v15 }
0x1028   :  { %v4587_v16 = vpop.eup %4586 }
0x1029   :  { %v3312_v18 = vmul.f32 %v4587_v16, %v4585_v13 }
0x102b   :  { %v3314_v19 = vmul.f32 %v3312_v18, %v3024_v4 }
0x102d   :  { %3315 = vst.msk [vmem:[%s5376_s24] sm:$0xff] %vm3013_vm7, %v3314_v19 }

</bundles_post_ra>
